<compile_context>
chip_gen: v6e
topology: v6e:2x2x1
jax: 0.10.0
libtpu: 0.0.40
codegen_flags: <defaults>
</compile_context>

<pallas_src>
import jax
import jax.numpy as jnp
from jax import lax
from jax.experimental import pallas as pl

# ----- model hyper-parameters (small, consistent with the module) -----
BATCH = 2
SEQ = 16          # sequence length n
DIM = 32          # model dim
HEADS = 2
DIM_HEAD = 16
INNER = HEADS * DIM_HEAD   # 32
KPROJ = 8          # Linformer projected sequence length k
FF_HIDDEN = 64     # dim * 2
EPS = 1e-5         # nn.LayerNorm default eps


def _layernorm(x, gamma, beta):
    # PyTorch LayerNorm: biased variance over last dim.
    mean = jnp.mean(x, axis=-1, keepdims=True)
    var = jnp.mean((x - mean) ** 2, axis=-1, keepdims=True)
    return (x - mean) * lax.rsqrt(var + EPS) * gamma + beta


# ------------------------- fused block kernel -------------------------
def block_kernel(x1_ref, x_ref,
                 ln1_g_ref, ln1_b_ref,
                 wq_ref, wk_ref, wv_ref,
                 et_ref, ft_ref, wo_ref, bo_ref,
                 ln2_g_ref, ln2_b_ref,
                 w1_ref, b1_ref, w2_ref, b2_ref,
                 out_ref):
    f32 = jnp.float32
    x1 = x1_ref[...].astype(f32)          # (B*SEQ, DIM)
    x = x_ref[...].astype(f32)            # (B*SEQ, DIM)

    # ---------------- attention branch: attn(x1, LayerNorm(x)) ----------------
    xn = _layernorm(x, ln1_g_ref[...], ln1_b_ref[...])

    # Whole-batch projections (single matmuls; Wq already carries the 1/sqrt(d) scale).
    q = jnp.dot(x1, wq_ref[...], preferred_element_type=f32)      # (B*SEQ, INNER)
    kk = jnp.dot(xn, wk_ref[...], preferred_element_type=f32)     # (B*SEQ, INNER)
    vv = jnp.dot(xn, wv_ref[...], preferred_element_type=f32)     # (B*SEQ, INNER)

    # Linformer sequence projection for all batches at once via block-diagonal
    # pre-transposed E / F: (B*KPROJ, B*SEQ) @ (B*SEQ, INNER) -> (B*KPROJ, INNER).
    kp = jnp.dot(et_ref[...], kk, preferred_element_type=f32)
    vp = jnp.dot(ft_ref[...], vv, preferred_element_type=f32)

    wo = wo_ref[...]                                              # (INNER, DIM)

    # Per-(batch, head) scaled-dot-product attention.  Heads are merged by
    # accumulating their Wo row-block contributions (no concat / relayout).
    contribs = []
    for b in range(BATCH):                                        # static unroll
        qs = b * SEQ
        ks = b * KPROJ
        acc_b = None
        for h in range(HEADS):                                    # static unroll
            c = h * DIM_HEAD
            qh = q[qs:qs + SEQ, c:c + DIM_HEAD]                   # (SEQ, DH)
            kh = kp[ks:ks + KPROJ, c:c + DIM_HEAD]                # (KPROJ, DH)
            vh = vp[ks:ks + KPROJ, c:c + DIM_HEAD]                # (KPROJ, DH)
            # contract over DH without materializing a transpose of kh
            dots = lax.dot_general(qh, kh, (((1,), (1,)), ((), ())),
                                   preferred_element_type=f32)    # (SEQ, KPROJ)
            dots = dots - jnp.max(dots, axis=-1, keepdims=True)
            p = jnp.exp(dots)
            denom = jnp.sum(p, axis=-1, keepdims=True)
            p = p * pl.reciprocal(denom, approx=True)             # EUP, ~free
            oh = jnp.dot(p, vh, preferred_element_type=f32)       # (SEQ, DH)
            ch = jnp.dot(oh, wo[c:c + DIM_HEAD, :],
                         preferred_element_type=f32)              # (SEQ, DIM)
            acc_b = ch if acc_b is None else acc_b + ch
        contribs.append(acc_b)
    # sublane-axis concat of the two (SEQ, DIM) batch slabs (rows multiple of 8)
    attn_out = jnp.concatenate(contribs, axis=0) + bo_ref[...]    # (B*SEQ, DIM)

    x_mid = x + attn_out                                          # residual 1

    # ---------------- feed-forward branch ----------------
    xn2 = _layernorm(x_mid, ln2_g_ref[...], ln2_b_ref[...])
    h1 = jnp.dot(xn2, w1_ref[...], preferred_element_type=f32) + b1_ref[...]
    # exact GELU (nn.GELU default): 0.5 * x * (1 + erf(x / sqrt(2)))
    h1 = 0.5 * h1 * (1.0 + lax.erf(h1 * (2.0 ** -0.5)))
    y = jnp.dot(h1, w2_ref[...], preferred_element_type=f32) + b2_ref[...]

    out_ref[...] = (x_mid + y).astype(out_ref.dtype)              # residual 2


# ------------------------- wrapper -------------------------
@jax.jit
def linformer_ca_block(x1, x, params):
    B, S, D = x.shape
    x1_flat = x1.reshape(B * S, D)
    x_flat = x.reshape(B * S, D)

    # Single fused kernel, no grid: the whole problem (~20 KB) lives in VMEM,
    # avoiding per-grid-step overhead and a second kernel launch.
    call = pl.pallas_call(
        block_kernel,
        out_shape=jax.ShapeDtypeStruct((B * S, D), x.dtype),
    )
    out_flat = call(
        x1_flat, x_flat,
        params["ln1_g"], params["ln1_b"],
        params["wq_scaled"], params["wk"], params["wv"],
        params["et_blk"], params["ft_blk"],
        params["wo"], params["bo"],
        params["ln2_g"], params["ln2_b"],
        params["w1"], params["b1"],
        params["w2"], params["b2"],
    )
    return x1, out_flat.reshape(B, S, D)


def init_params(key):
    ks = jax.random.split(key, 8)
    s = 0.02
    wq = s * jax.random.normal(ks[0], (DIM, INNER), jnp.float32)
    e = s * jax.random.normal(ks[3], (SEQ, KPROJ), jnp.float32)
    f = s * jax.random.normal(ks[4], (SEQ, KPROJ), jnp.float32)
    eye_b = jnp.eye(BATCH, dtype=jnp.float32)
    params = {
        # PreNormCross LayerNorm
        "ln1_g": jnp.ones((1, DIM), jnp.float32),
        "ln1_b": jnp.zeros((1, DIM), jnp.float32),
        # Linformer cross-attention (raw weights, used by the reference)
        "wq": wq,
        "wk": s * jax.random.normal(ks[1], (DIM, INNER), jnp.float32),
        "wv": s * jax.random.normal(ks[2], (DIM, INNER), jnp.float32),
        "e": e,
        "f": f,
        "wo": s * jax.random.normal(ks[5], (INNER, DIM), jnp.float32),
        "bo": jnp.zeros((1, DIM), jnp.float32),
        # PreNorm LayerNorm
        "ln2_g": jnp.ones((1, DIM), jnp.float32),
        "ln2_b": jnp.zeros((1, DIM), jnp.float32),
        # FeedForward
        "w1": s * jax.random.normal(ks[6], (DIM, FF_HIDDEN), jnp.float32),
        "b1": jnp.zeros((1, FF_HIDDEN), jnp.float32),
        "w2": s * jax.random.normal(ks[7], (FF_HIDDEN, DIM), jnp.float32),
        "b2": jnp.zeros((1, DIM), jnp.float32),
    }
    # Kernel-friendly derived weights (one-time, host-side):
    #   * attention scale folded into Wq
    #   * E / F pre-transposed and block-diagonalised over batch
    params["wq_scaled"] = wq * (DIM_HEAD ** -0.5)
    params["et_blk"] = jnp.kron(eye_b, e.T)   # (B*KPROJ, B*SEQ)
    params["ft_blk"] = jnp.kron(eye_b, f.T)   # (B*KPROJ, B*SEQ)
    return params


# ------------------------- pure-JAX reference -------------------------
def reference(x1, x, p):
    def ln(v, g, b):
        m = v.mean(-1, keepdims=True)
        var = ((v - m) ** 2).mean(-1, keepdims=True)
        return (v - m) / jnp.sqrt(var + EPS) * g + b

    B, S, D = x.shape
    xn = ln(x, p["ln1_g"], p["ln1_b"])
    q = jnp.einsum("bsd,de->bse", x1, p["wq"]) * (DIM_HEAD ** -0.5)
    k = jnp.einsum("bsd,de->bse", xn, p["wk"])
    v = jnp.einsum("bsd,de->bse", xn, p["wv"])
    kp = jnp.einsum("sk,bse->bke", p["e"], k)       # (B, KPROJ, INNER)
    vp = jnp.einsum("sk,bse->bke", p["f"], v)
    qh = q.reshape(B, S, HEADS, DIM_HEAD)
    kh = kp.reshape(B, KPROJ, HEADS, DIM_HEAD)
    vh = vp.reshape(B, KPROJ, HEADS, DIM_HEAD)
    dots = jnp.einsum("bqhd,bkhd->bhqk", qh, kh)
    pa = jax.nn.softmax(dots, axis=-1)
    o = jnp.einsum("bhqk,bkhd->bqhd", pa, vh).reshape(B, S, INNER)
    attn_out = o @ p["wo"] + p["bo"]
    xm = x + attn_out
    xn2 = ln(xm, p["ln2_g"], p["ln2_b"])
    h = xn2 @ p["w1"] + p["b1"]
    h = 0.5 * h * (1.0 + jax.scipy.special.erf(h / jnp.sqrt(2.0)))
    y = h @ p["w2"] + p["b2"]
    return xm + y


if __name__ == "__main__":
    key = jax.random.PRNGKey(0)
    k1, k2, kparam = jax.random.split(key, 3)
    x1 = jax.random.normal(k1, (BATCH, SEQ, DIM), jnp.float32)
    x = jax.random.normal(k2, (BATCH, SEQ, DIM), jnp.float32)
    params = init_params(kparam)

    out_x1, out_x = linformer_ca_block(x1, x, params)
    jax.block_until_ready((out_x1, out_x))

    assert out_x1.shape == (BATCH, SEQ, DIM)
    assert out_x.shape == (BATCH, SEQ, DIM)

    ref = reference(x1, x, params)
    assert bool(jnp.all(jnp.isfinite(out_x)))
    # generous tolerance: kernel uses EUP approximate reciprocal in softmax
    assert bool(jnp.allclose(out_x, ref, atol=1e-2, rtol=1e-2))

    print("KERNEL_OK")
</pallas_src>

<mosaic_0001>
module attributes {stable_mosaic.version = 11 : i64} {
  func.func @block_kernel(%arg0: memref<32x32xf32, #tpu.memory_space<vmem>>, %arg1: memref<32x32xf32, #tpu.memory_space<vmem>>, %arg2: memref<1x32xf32, #tpu.memory_space<vmem>>, %arg3: memref<1x32xf32, #tpu.memory_space<vmem>>, %arg4: memref<32x32xf32, #tpu.memory_space<vmem>>, %arg5: memref<32x32xf32, #tpu.memory_space<vmem>>, %arg6: memref<32x32xf32, #tpu.memory_space<vmem>>, %arg7: memref<16x32xf32, #tpu.memory_space<vmem>>, %arg8: memref<16x32xf32, #tpu.memory_space<vmem>>, %arg9: memref<32x32xf32, #tpu.memory_space<vmem>>, %arg10: memref<1x32xf32, #tpu.memory_space<vmem>>, %arg11: memref<1x32xf32, #tpu.memory_space<vmem>>, %arg12: memref<1x32xf32, #tpu.memory_space<vmem>>, %arg13: memref<32x64xf32, #tpu.memory_space<vmem>>, %arg14: memref<1x64xf32, #tpu.memory_space<vmem>>, %arg15: memref<64x32xf32, #tpu.memory_space<vmem>>, %arg16: memref<1x32xf32, #tpu.memory_space<vmem>>, %arg17: memref<32x32xf32, #tpu.memory_space<vmem>>) attributes {dimension_semantics = [], scalar_prefetch = 0 : i64, scratch_operands = 0 : i64, tpu.core_type = #tpu.core_type<tc>} {
    %c0 = arith.constant 0 : index
    %c0_0 = arith.constant 0 : index
    %0 = vector.load %arg0[%c0, %c0_0] : memref<32x32xf32, #tpu.memory_space<vmem>>, vector<32x32xf32>
    %c0_1 = arith.constant 0 : index
    %c0_2 = arith.constant 0 : index
    %1 = vector.load %arg1[%c0_1, %c0_2] : memref<32x32xf32, #tpu.memory_space<vmem>>, vector<32x32xf32>
    %c0_3 = arith.constant 0 : index
    %c0_4 = arith.constant 0 : index
    %2 = vector.load %arg2[%c0_3, %c0_4] : memref<1x32xf32, #tpu.memory_space<vmem>>, vector<1x32xf32>
    %c0_5 = arith.constant 0 : index
    %c0_6 = arith.constant 0 : index
    %3 = vector.load %arg3[%c0_5, %c0_6] : memref<1x32xf32, #tpu.memory_space<vmem>>, vector<1x32xf32>
    %cst = arith.constant dense<0.000000e+00> : vector<32xf32>
    %4 = vector.multi_reduction <add>, %1, %cst [1] : vector<32x32xf32> to vector<32xf32>
    %5 = vector.shape_cast %4 : vector<32xf32> to vector<32x1xf32>
    %cst_7 = arith.constant 3.200000e+01 : f32
    %6 = vector.broadcast %cst_7 : f32 to vector<32x1xf32>
    %7 = arith.divf %5, %6 : vector<32x1xf32>
    %8 = vector.broadcast %7 : vector<32x1xf32> to vector<32x32xf32>
    %9 = arith.subf %1, %8 : vector<32x32xf32>
    %10 = arith.mulf %9, %9 : vector<32x32xf32>
    %cst_8 = arith.constant dense<0.000000e+00> : vector<32xf32>
    %11 = vector.multi_reduction <add>, %10, %cst_8 [1] : vector<32x32xf32> to vector<32xf32>
    %12 = vector.shape_cast %11 : vector<32xf32> to vector<32x1xf32>
    %cst_9 = arith.constant 3.200000e+01 : f32
    %13 = vector.broadcast %cst_9 : f32 to vector<32x1xf32>
    %14 = arith.divf %12, %13 : vector<32x1xf32>
    %15 = vector.broadcast %7 : vector<32x1xf32> to vector<32x32xf32>
    %16 = arith.subf %1, %15 : vector<32x32xf32>
    %cst_10 = arith.constant 9.99999974E-6 : f32
    %17 = vector.broadcast %cst_10 : f32 to vector<32x1xf32>
    %18 = arith.addf %14, %17 : vector<32x1xf32>
    %19 = math.rsqrt %18 : vector<32x1xf32>
    %20 = vector.broadcast %19 : vector<32x1xf32> to vector<32x32xf32>
    %21 = arith.mulf %16, %20 : vector<32x32xf32>
    %22 = vector.broadcast %2 : vector<1x32xf32> to vector<32x32xf32>
    %23 = arith.mulf %21, %22 : vector<32x32xf32>
    %24 = vector.broadcast %3 : vector<1x32xf32> to vector<32x32xf32>
    %25 = arith.addf %23, %24 : vector<32x32xf32>
    %c0_11 = arith.constant 0 : index
    %c0_12 = arith.constant 0 : index
    %26 = vector.load %arg4[%c0_11, %c0_12] : memref<32x32xf32, #tpu.memory_space<vmem>>, vector<32x32xf32>
    %cst_13 = arith.constant dense<0.000000e+00> : vector<32x32xf32>
    %27 = tpu.matmul %0, %26, %cst_13 {dimension_numbers = #tpu.dot_dimension_numbers<[1], [0], [0], [1], [0, 0, 1, 1], [], []>} : vector<32x32xf32>, vector<32x32xf32>, vector<32x32xf32> -> vector<32x32xf32>
    %c0_14 = arith.constant 0 : index
    %c0_15 = arith.constant 0 : index
    %28 = vector.load %arg5[%c0_14, %c0_15] : memref<32x32xf32, #tpu.memory_space<vmem>>, vector<32x32xf32>
    %cst_16 = arith.constant dense<0.000000e+00> : vector<32x32xf32>
    %29 = tpu.matmul %25, %28, %cst_16 {dimension_numbers = #tpu.dot_dimension_numbers<[1], [0], [0], [1], [0, 0, 1, 1], [], []>} : vector<32x32xf32>, vector<32x32xf32>, vector<32x32xf32> -> vector<32x32xf32>
    %c0_17 = arith.constant 0 : index
    %c0_18 = arith.constant 0 : index
    %30 = vector.load %arg6[%c0_17, %c0_18] : memref<32x32xf32, #tpu.memory_space<vmem>>, vector<32x32xf32>
    %cst_19 = arith.constant dense<0.000000e+00> : vector<32x32xf32>
    %31 = tpu.matmul %25, %30, %cst_19 {dimension_numbers = #tpu.dot_dimension_numbers<[1], [0], [0], [1], [0, 0, 1, 1], [], []>} : vector<32x32xf32>, vector<32x32xf32>, vector<32x32xf32> -> vector<32x32xf32>
    %c0_20 = arith.constant 0 : index
    %c0_21 = arith.constant 0 : index
    %32 = vector.load %arg7[%c0_20, %c0_21] : memref<16x32xf32, #tpu.memory_space<vmem>>, vector<16x32xf32>
    %cst_22 = arith.constant dense<0.000000e+00> : vector<16x32xf32>
    %33 = tpu.matmul %32, %29, %cst_22 {dimension_numbers = #tpu.dot_dimension_numbers<[1], [0], [0], [1], [0, 0, 1, 1], [], []>} : vector<16x32xf32>, vector<32x32xf32>, vector<16x32xf32> -> vector<16x32xf32>
    %c0_23 = arith.constant 0 : index
    %c0_24 = arith.constant 0 : index
    %34 = vector.load %arg8[%c0_23, %c0_24] : memref<16x32xf32, #tpu.memory_space<vmem>>, vector<16x32xf32>
    %cst_25 = arith.constant dense<0.000000e+00> : vector<16x32xf32>
    %35 = tpu.matmul %34, %31, %cst_25 {dimension_numbers = #tpu.dot_dimension_numbers<[1], [0], [0], [1], [0, 0, 1, 1], [], []>} : vector<16x32xf32>, vector<32x32xf32>, vector<16x32xf32> -> vector<16x32xf32>
    %c0_26 = arith.constant 0 : index
    %c0_27 = arith.constant 0 : index
    %36 = vector.load %arg9[%c0_26, %c0_27] : memref<32x32xf32, #tpu.memory_space<vmem>>, vector<32x32xf32>
    %37 = vector.extract_strided_slice %27 {offsets = [0, 0], sizes = [16, 16], strides = [1, 1]} : vector<32x32xf32> to vector<16x16xf32>
    %38 = vector.extract_strided_slice %33 {offsets = [0, 0], sizes = [8, 16], strides = [1, 1]} : vector<16x32xf32> to vector<8x16xf32>
    %39 = vector.extract_strided_slice %35 {offsets = [0, 0], sizes = [8, 16], strides = [1, 1]} : vector<16x32xf32> to vector<8x16xf32>
    %cst_28 = arith.constant dense<0.000000e+00> : vector<16x8xf32>
    %40 = tpu.matmul %37, %38, %cst_28 {dimension_numbers = #tpu.dot_dimension_numbers<[1], [1], [0], [0], [0, 0, 1, 0], [], []>} : vector<16x16xf32>, vector<8x16xf32>, vector<16x8xf32> -> vector<16x8xf32>
    %cst_29 = arith.constant dense<0xFF800000> : vector<16xf32>
    %41 = vector.multi_reduction <maximumf>, %40, %cst_29 [1] : vector<16x8xf32> to vector<16xf32>
    %42 = vector.shape_cast %41 : vector<16xf32> to vector<16x1xf32>
    %43 = vector.broadcast %42 : vector<16x1xf32> to vector<16x8xf32>
    %44 = arith.subf %40, %43 : vector<16x8xf32>
    %45 = math.exp %44 : vector<16x8xf32>
    %cst_30 = arith.constant dense<0.000000e+00> : vector<16xf32>
    %46 = vector.multi_reduction <add>, %45, %cst_30 [1] : vector<16x8xf32> to vector<16xf32>
    %47 = vector.shape_cast %46 : vector<16xf32> to vector<16x1xf32>
    %48 = tpu.reciprocal %47 {approx = true} : vector<16x1xf32> -> vector<16x1xf32>
    %49 = vector.broadcast %48 : vector<16x1xf32> to vector<16x8xf32>
    %50 = arith.mulf %45, %49 : vector<16x8xf32>
    %cst_31 = arith.constant dense<0.000000e+00> : vector<16x16xf32>
    %51 = tpu.matmul %50, %39, %cst_31 {dimension_numbers = #tpu.dot_dimension_numbers<[1], [0], [0], [1], [0, 0, 1, 1], [], []>} : vector<16x8xf32>, vector<8x16xf32>, vector<16x16xf32> -> vector<16x16xf32>
    %52 = vector.extract_strided_slice %36 {offsets = [0, 0], sizes = [16, 32], strides = [1, 1]} : vector<32x32xf32> to vector<16x32xf32>
    %cst_32 = arith.constant dense<0.000000e+00> : vector<16x32xf32>
    %53 = tpu.matmul %51, %52, %cst_32 {dimension_numbers = #tpu.dot_dimension_numbers<[1], [0], [0], [1], [0, 0, 1, 1], [], []>} : vector<16x16xf32>, vector<16x32xf32>, vector<16x32xf32> -> vector<16x32xf32>
    %54 = vector.extract_strided_slice %27 {offsets = [0, 16], sizes = [16, 16], strides = [1, 1]} : vector<32x32xf32> to vector<16x16xf32>
    %55 = vector.extract_strided_slice %33 {offsets = [0, 16], sizes = [8, 16], strides = [1, 1]} : vector<16x32xf32> to vector<8x16xf32>
    %56 = vector.extract_strided_slice %35 {offsets = [0, 16], sizes = [8, 16], strides = [1, 1]} : vector<16x32xf32> to vector<8x16xf32>
    %cst_33 = arith.constant dense<0.000000e+00> : vector<16x8xf32>
    %57 = tpu.matmul %54, %55, %cst_33 {dimension_numbers = #tpu.dot_dimension_numbers<[1], [1], [0], [0], [0, 0, 1, 0], [], []>} : vector<16x16xf32>, vector<8x16xf32>, vector<16x8xf32> -> vector<16x8xf32>
    %cst_34 = arith.constant dense<0xFF800000> : vector<16xf32>
    %58 = vector.multi_reduction <maximumf>, %57, %cst_34 [1] : vector<16x8xf32> to vector<16xf32>
    %59 = vector.shape_cast %58 : vector<16xf32> to vector<16x1xf32>
    %60 = vector.broadcast %59 : vector<16x1xf32> to vector<16x8xf32>
    %61 = arith.subf %57, %60 : vector<16x8xf32>
    %62 = math.exp %61 : vector<16x8xf32>
    %cst_35 = arith.constant dense<0.000000e+00> : vector<16xf32>
    %63 = vector.multi_reduction <add>, %62, %cst_35 [1] : vector<16x8xf32> to vector<16xf32>
    %64 = vector.shape_cast %63 : vector<16xf32> to vector<16x1xf32>
    %65 = tpu.reciprocal %64 {approx = true} : vector<16x1xf32> -> vector<16x1xf32>
    %66 = vector.broadcast %65 : vector<16x1xf32> to vector<16x8xf32>
    %67 = arith.mulf %62, %66 : vector<16x8xf32>
    %cst_36 = arith.constant dense<0.000000e+00> : vector<16x16xf32>
    %68 = tpu.matmul %67, %56, %cst_36 {dimension_numbers = #tpu.dot_dimension_numbers<[1], [0], [0], [1], [0, 0, 1, 1], [], []>} : vector<16x8xf32>, vector<8x16xf32>, vector<16x16xf32> -> vector<16x16xf32>
    %69 = vector.extract_strided_slice %36 {offsets = [16, 0], sizes = [16, 32], strides = [1, 1]} : vector<32x32xf32> to vector<16x32xf32>
    %cst_37 = arith.constant dense<0.000000e+00> : vector<16x32xf32>
    %70 = tpu.matmul %68, %69, %cst_37 {dimension_numbers = #tpu.dot_dimension_numbers<[1], [0], [0], [1], [0, 0, 1, 1], [], []>} : vector<16x16xf32>, vector<16x32xf32>, vector<16x32xf32> -> vector<16x32xf32>
    %71 = arith.addf %53, %70 : vector<16x32xf32>
    %72 = vector.extract_strided_slice %27 {offsets = [16, 0], sizes = [16, 16], strides = [1, 1]} : vector<32x32xf32> to vector<16x16xf32>
    %73 = vector.extract_strided_slice %33 {offsets = [8, 0], sizes = [8, 16], strides = [1, 1]} : vector<16x32xf32> to vector<8x16xf32>
    %74 = vector.extract_strided_slice %35 {offsets = [8, 0], sizes = [8, 16], strides = [1, 1]} : vector<16x32xf32> to vector<8x16xf32>
    %cst_38 = arith.constant dense<0.000000e+00> : vector<16x8xf32>
    %75 = tpu.matmul %72, %73, %cst_38 {dimension_numbers = #tpu.dot_dimension_numbers<[1], [1], [0], [0], [0, 0, 1, 0], [], []>} : vector<16x16xf32>, vector<8x16xf32>, vector<16x8xf32> -> vector<16x8xf32>
    %cst_39 = arith.constant dense<0xFF800000> : vector<16xf32>
    %76 = vector.multi_reduction <maximumf>, %75, %cst_39 [1] : vector<16x8xf32> to vector<16xf32>
    %77 = vector.shape_cast %76 : vector<16xf32> to vector<16x1xf32>
    %78 = vector.broadcast %77 : vector<16x1xf32> to vector<16x8xf32>
    %79 = arith.subf %75, %78 : vector<16x8xf32>
    %80 = math.exp %79 : vector<16x8xf32>
    %cst_40 = arith.constant dense<0.000000e+00> : vector<16xf32>
    %81 = vector.multi_reduction <add>, %80, %cst_40 [1] : vector<16x8xf32> to vector<16xf32>
    %82 = vector.shape_cast %81 : vector<16xf32> to vector<16x1xf32>
    %83 = tpu.reciprocal %82 {approx = true} : vector<16x1xf32> -> vector<16x1xf32>
    %84 = vector.broadcast %83 : vector<16x1xf32> to vector<16x8xf32>
    %85 = arith.mulf %80, %84 : vector<16x8xf32>
    %cst_41 = arith.constant dense<0.000000e+00> : vector<16x16xf32>
    %86 = tpu.matmul %85, %74, %cst_41 {dimension_numbers = #tpu.dot_dimension_numbers<[1], [0], [0], [1], [0, 0, 1, 1], [], []>} : vector<16x8xf32>, vector<8x16xf32>, vector<16x16xf32> -> vector<16x16xf32>
    %87 = vector.extract_strided_slice %36 {offsets = [0, 0], sizes = [16, 32], strides = [1, 1]} : vector<32x32xf32> to vector<16x32xf32>
    %cst_42 = arith.constant dense<0.000000e+00> : vector<16x32xf32>
    %88 = tpu.matmul %86, %87, %cst_42 {dimension_numbers = #tpu.dot_dimension_numbers<[1], [0], [0], [1], [0, 0, 1, 1], [], []>} : vector<16x16xf32>, vector<16x32xf32>, vector<16x32xf32> -> vector<16x32xf32>
    %89 = vector.extract_strided_slice %27 {offsets = [16, 16], sizes = [16, 16], strides = [1, 1]} : vector<32x32xf32> to vector<16x16xf32>
    %90 = vector.extract_strided_slice %33 {offsets = [8, 16], sizes = [8, 16], strides = [1, 1]} : vector<16x32xf32> to vector<8x16xf32>
    %91 = vector.extract_strided_slice %35 {offsets = [8, 16], sizes = [8, 16], strides = [1, 1]} : vector<16x32xf32> to vector<8x16xf32>
    %cst_43 = arith.constant dense<0.000000e+00> : vector<16x8xf32>
    %92 = tpu.matmul %89, %90, %cst_43 {dimension_numbers = #tpu.dot_dimension_numbers<[1], [1], [0], [0], [0, 0, 1, 0], [], []>} : vector<16x16xf32>, vector<8x16xf32>, vector<16x8xf32> -> vector<16x8xf32>
    %cst_44 = arith.constant dense<0xFF800000> : vector<16xf32>
    %93 = vector.multi_reduction <maximumf>, %92, %cst_44 [1] : vector<16x8xf32> to vector<16xf32>
    %94 = vector.shape_cast %93 : vector<16xf32> to vector<16x1xf32>
    %95 = vector.broadcast %94 : vector<16x1xf32> to vector<16x8xf32>
    %96 = arith.subf %92, %95 : vector<16x8xf32>
    %97 = math.exp %96 : vector<16x8xf32>
    %cst_45 = arith.constant dense<0.000000e+00> : vector<16xf32>
    %98 = vector.multi_reduction <add>, %97, %cst_45 [1] : vector<16x8xf32> to vector<16xf32>
    %99 = vector.shape_cast %98 : vector<16xf32> to vector<16x1xf32>
    %100 = tpu.reciprocal %99 {approx = true} : vector<16x1xf32> -> vector<16x1xf32>
    %101 = vector.broadcast %100 : vector<16x1xf32> to vector<16x8xf32>
    %102 = arith.mulf %97, %101 : vector<16x8xf32>
    %cst_46 = arith.constant dense<0.000000e+00> : vector<16x16xf32>
    %103 = tpu.matmul %102, %91, %cst_46 {dimension_numbers = #tpu.dot_dimension_numbers<[1], [0], [0], [1], [0, 0, 1, 1], [], []>} : vector<16x8xf32>, vector<8x16xf32>, vector<16x16xf32> -> vector<16x16xf32>
    %104 = vector.extract_strided_slice %36 {offsets = [16, 0], sizes = [16, 32], strides = [1, 1]} : vector<32x32xf32> to vector<16x32xf32>
    %cst_47 = arith.constant dense<0.000000e+00> : vector<16x32xf32>
    %105 = tpu.matmul %103, %104, %cst_47 {dimension_numbers = #tpu.dot_dimension_numbers<[1], [0], [0], [1], [0, 0, 1, 1], [], []>} : vector<16x16xf32>, vector<16x32xf32>, vector<16x32xf32> -> vector<16x32xf32>
    %106 = arith.addf %88, %105 : vector<16x32xf32>
    %107 = tpu.concatenate %71, %106 in 0 : vector<16x32xf32>, vector<16x32xf32> -> vector<32x32xf32>
    %c0_48 = arith.constant 0 : index
    %c0_49 = arith.constant 0 : index
    %108 = vector.load %arg10[%c0_48, %c0_49] : memref<1x32xf32, #tpu.memory_space<vmem>>, vector<1x32xf32>
    %109 = vector.broadcast %108 : vector<1x32xf32> to vector<32x32xf32>
    %110 = arith.addf %107, %109 : vector<32x32xf32>
    %111 = arith.addf %1, %110 : vector<32x32xf32>
    %c0_50 = arith.constant 0 : index
    %c0_51 = arith.constant 0 : index
    %112 = vector.load %arg11[%c0_50, %c0_51] : memref<1x32xf32, #tpu.memory_space<vmem>>, vector<1x32xf32>
    %c0_52 = arith.constant 0 : index
    %c0_53 = arith.constant 0 : index
    %113 = vector.load %arg12[%c0_52, %c0_53] : memref<1x32xf32, #tpu.memory_space<vmem>>, vector<1x32xf32>
    %cst_54 = arith.constant dense<0.000000e+00> : vector<32xf32>
    %114 = vector.multi_reduction <add>, %111, %cst_54 [1] : vector<32x32xf32> to vector<32xf32>
    %115 = vector.shape_cast %114 : vector<32xf32> to vector<32x1xf32>
    %cst_55 = arith.constant 3.200000e+01 : f32
    %116 = vector.broadcast %cst_55 : f32 to vector<32x1xf32>
    %117 = arith.divf %115, %116 : vector<32x1xf32>
    %118 = vector.broadcast %117 : vector<32x1xf32> to vector<32x32xf32>
    %119 = arith.subf %111, %118 : vector<32x32xf32>
    %120 = arith.mulf %119, %119 : vector<32x32xf32>
    %cst_56 = arith.constant dense<0.000000e+00> : vector<32xf32>
    %121 = vector.multi_reduction <add>, %120, %cst_56 [1] : vector<32x32xf32> to vector<32xf32>
    %122 = vector.shape_cast %121 : vector<32xf32> to vector<32x1xf32>
    %cst_57 = arith.constant 3.200000e+01 : f32
    %123 = vector.broadcast %cst_57 : f32 to vector<32x1xf32>
    %124 = arith.divf %122, %123 : vector<32x1xf32>
    %125 = vector.broadcast %117 : vector<32x1xf32> to vector<32x32xf32>
    %126 = arith.subf %111, %125 : vector<32x32xf32>
    %cst_58 = arith.constant 9.99999974E-6 : f32
    %127 = vector.broadcast %cst_58 : f32 to vector<32x1xf32>
    %128 = arith.addf %124, %127 : vector<32x1xf32>
    %129 = math.rsqrt %128 : vector<32x1xf32>
    %130 = vector.broadcast %129 : vector<32x1xf32> to vector<32x32xf32>
    %131 = arith.mulf %126, %130 : vector<32x32xf32>
    %132 = vector.broadcast %112 : vector<1x32xf32> to vector<32x32xf32>
    %133 = arith.mulf %131, %132 : vector<32x32xf32>
    %134 = vector.broadcast %113 : vector<1x32xf32> to vector<32x32xf32>
    %135 = arith.addf %133, %134 : vector<32x32xf32>
    %c0_59 = arith.constant 0 : index
    %c0_60 = arith.constant 0 : index
    %136 = vector.load %arg13[%c0_59, %c0_60] : memref<32x64xf32, #tpu.memory_space<vmem>>, vector<32x64xf32>
    %cst_61 = arith.constant dense<0.000000e+00> : vector<32x64xf32>
    %137 = tpu.matmul %135, %136, %cst_61 {dimension_numbers = #tpu.dot_dimension_numbers<[1], [0], [0], [1], [0, 0, 1, 1], [], []>} : vector<32x32xf32>, vector<32x64xf32>, vector<32x64xf32> -> vector<32x64xf32>
    %c0_62 = arith.constant 0 : index
    %c0_63 = arith.constant 0 : index
    %138 = vector.load %arg14[%c0_62, %c0_63] : memref<1x64xf32, #tpu.memory_space<vmem>>, vector<1x64xf32>
    %139 = vector.broadcast %138 : vector<1x64xf32> to vector<32x64xf32>
    %140 = arith.addf %137, %139 : vector<32x64xf32>
    %cst_64 = arith.constant 5.000000e-01 : f32
    %141 = vector.broadcast %cst_64 : f32 to vector<32x64xf32>
    %142 = arith.mulf %141, %140 : vector<32x64xf32>
    %cst_65 = arith.constant 0.707106769 : f32
    %143 = vector.broadcast %cst_65 : f32 to vector<32x64xf32>
    %144 = arith.mulf %140, %143 : vector<32x64xf32>
    %145 = math.erf %144 : vector<32x64xf32>
    %cst_66 = arith.constant 1.000000e+00 : f32
    %146 = vector.broadcast %cst_66 : f32 to vector<32x64xf32>
    %147 = arith.addf %146, %145 : vector<32x64xf32>
    %148 = arith.mulf %142, %147 : vector<32x64xf32>
    %c0_67 = arith.constant 0 : index
    %c0_68 = arith.constant 0 : index
    %149 = vector.load %arg15[%c0_67, %c0_68] : memref<64x32xf32, #tpu.memory_space<vmem>>, vector<64x32xf32>
    %cst_69 = arith.constant dense<0.000000e+00> : vector<32x32xf32>
    %150 = tpu.matmul %148, %149, %cst_69 {dimension_numbers = #tpu.dot_dimension_numbers<[1], [0], [0], [1], [0, 0, 1, 1], [], []>} : vector<32x64xf32>, vector<64x32xf32>, vector<32x32xf32> -> vector<32x32xf32>
    %c0_70 = arith.constant 0 : index
    %c0_71 = arith.constant 0 : index
    %151 = vector.load %arg16[%c0_70, %c0_71] : memref<1x32xf32, #tpu.memory_space<vmem>>, vector<1x32xf32>
    %152 = vector.broadcast %151 : vector<1x32xf32> to vector<32x32xf32>
    %153 = arith.addf %150, %152 : vector<32x32xf32>
    %154 = arith.addf %111, %153 : vector<32x32xf32>
    %c0_72 = arith.constant 0 : index
    %c0_73 = arith.constant 0 : index
    %155 = vector.load %arg17[%c0_72, %c0_73] : memref<32x32xf32, #tpu.memory_space<vmem>>, vector<32x32xf32>
    tpu.vector_store %arg17[%c0_72, %c0_73], %154 {strides = array<i32>} : memref<32x32xf32, #tpu.memory_space<vmem>>, vector<32x32xf32>,
    return
  }
}

</mosaic_0001>

<bundles_post_ra>
// kernel: linformer_ca_block.1
= control target key start
LH: loop header
LB: loop body
LE: loop exit
PB: predicated region body
PF: predicated region fallthrough
CT: control target
= control target key end

     0   :  { %s3180_s0 = inlined_call_operand.vmem [shape: f32[32,32], index: 0, kind: input, shape index: {}]   ;;  %s3181_s1 = inlined_call_operand.vmem [shape: f32[32,32], index: 1, kind: input, shape index: {}]   ;;  %s3182_s2 = inlined_call_operand.hbm [shape: f32[1,32], index: 2, kind: input, shape index: {}]   ;;  %s3183_s3 = inlined_call_operand.vmem [shape: f32[1,32], index: 3, kind: input, shape index: {}]   ;;  %s3184_s4 = inlined_call_operand.vmem [shape: f32[32,32], index: 4, kind: input, shape index: {}]   ;;  %s3185_s5 = inlined_call_operand.hbm [shape: f32[32,32], index: 5, kind: input, shape index: {}]   ;;  %s3186_s6 = inlined_call_operand.hbm [shape: f32[32,32], index: 6, kind: input, shape index: {}]   ;;  %s3187_s7 = inlined_call_operand.vmem [shape: f32[16,32], index: 7, kind: input, shape index: {}]   ;;  %s3188_s8 = inlined_call_operand.hbm [shape: f32[16,32], index: 8, kind: input, shape index: {}]   ;;  %s3189_s9 = inlined_call_operand.hbm [shape: f32[32,32], index: 9, kind: input, shape index: {}]   ;;  %s3190_s10 = inlined_call_operand.vmem [shape: f32[1,32], index: 10, kind: input, shape index: {}]   ;;  %s3191_s11 = inlined_call_operand.hbm [shape: f32[1,32], index: 11, kind: input, shape index: {}]   ;;  %s3192_s12 = inlined_call_operand.hbm [shape: f32[1,32], index: 12, kind: input, shape index: {}]   ;;  %s3193_s13 = inlined_call_operand.hbm [shape: f32[32,64], index: 13, kind: input, shape index: {}]   ;;  %s3194_s14 = inlined_call_operand.vmem [shape: f32[1,64], index: 14, kind: input, shape index: {}]   ;;  %s3195_s15 = inlined_call_operand.vmem [shape: f32[64,32], index: 15, kind: input, shape index: {}]   ;;  %s3196_s16 = inlined_call_operand.vmem [shape: f32[1,32], index: 16, kind: input, shape index: {}]   ;;  %s3197_s17 = inlined_call_operand.hbm [shape: f32[32,32], index: 17, kind: output, shape index: {}]  }
   0x1   :  { %3200 = sst [smem:[#allocation23_spill]] %s3180_s0 }
   0x2   :  { %3201 = sst [smem:[#allocation24_spill]] %s3181_s1 }
   0x3   :  { %22 = vsyncpa [#allocation3], 0 }
   0x4   :  { %23 = vsyncpa [#allocation6], 0 }
   0x5   :  { %24 = vsyncpa [#allocation9], 0 }
   0x6   :  { %25 = vsyncpa [#allocation12], 0 }
   0x7   :  { %26 = vsyncpa [#allocation15], 0 }
   0x8   :  { %27 = vsyncpa [#allocation4], 0  ;;  %s2735_s24 = smov [#allocation5]  }
   0x9   :  { %s51_s25 = sshll.u32 %s2735_s24, 4  ;;  %s52_s25 = int_to_ptr.vmem [resolvable:$true] %s51_s25 }
   0xa   :  { %s2551_s26 = scalar_lea.vmem %s52_s25, 512  ;;  %p2556_p1 = scmp.lt.s32.totalorder %s52_s25, %s52_s25 }
   0xb   :  { %p2552_p0 = scmp.ne.s32.totalorder %s52_s25, %s2551_s26  ;;  %p2557_p2 = scmp.lt.s32.totalorder %s2551_s26, %s2551_s26 }
   0xd   :  { %p2558_p3 = por %p2557_p2, %p2556_p1 }
   0xf   :  { %p2559_p4 = pnand %p2558_p3, %p2552_p0 }
  0x11   :  { %2562 = shalt.err (!%p2559_p4)
}
  0x12   :  { %s2736_s27 = smov 128   ;;  %s2737_s28 = smov 8  }
  0x13   :  { %57 = dma.hbm_to_vmem [thread:$0]  %s3185_s5, 512, %s52_s25, [#allocation6], %s2736_s27, %s2736_s27, %s2737_s28  }
  0x14   :  { %s2738_s30 = smov [#allocation8]   ;;  %s2739_s19 = smov [#allocation11]  }
  0x15   :  { %s77_s18 = sshll.u32 %s2738_s30, 4  ;;  %s104_s1 = sshll.u32 %s2739_s19, 4  ;;  %s78_s18 = int_to_ptr.vmem [resolvable:$true] %s77_s18  ;;  %s105_s1 = int_to_ptr.vmem [resolvable:$true] %s104_s1 }
  0x16   :  { %s2571_s20 = scalar_lea.vmem %s78_s18, 256  ;;  %p2576_p6 = scmp.lt.s32.totalorder %s78_s18, %s78_s18 }
  0x17   :  { %p2572_p5 = scmp.ne.s32.totalorder %s78_s18, %s2571_s20  ;;  %p2577_p7 = scmp.lt.s32.totalorder %s2571_s20, %s2571_s20 }
  0x19   :  { %p2578_p8 = por %p2577_p7, %p2576_p6 }
  0x1b   :  { %p2579_p9 = pnand %p2578_p8, %p2572_p5 }
  0x1d   :  { %2582 = shalt.err (!%p2579_p9)
}
  0x1e   :  { %83 = dma.hbm_to_vmem [thread:$0]  %s3188_s8, 256, %s78_s18, [#allocation9], %s2736_s27, %s2736_s27, %s2737_s28  }
  0x1f   :  { %s2591_s5 = scalar_lea.vmem %s105_s1, 16  ;;  %s2595_s23 = scalar_lea.vmem %s105_s1, 32 }
  0x20   :  { %p2592_p10 = scmp.ne.s32.totalorder %s105_s1, %s2591_s5  ;;  %p2596_p11 = scmp.lt.s32.totalorder %s105_s1, %s105_s1 }
  0x21   :  { %p2597_p12 = scmp.lt.s32.totalorder %s2595_s23, %s2591_s5 }
  0x23   :  { %p2598_p13 = por %p2597_p12, %p2596_p11 }
  0x25   :  { %p2599_p0 = pnand %p2598_p13, %p2592_p10 }
  0x27   :  { %2602 = shalt.err (!%p2599_p0)
}
  0x28   :  { %107 = dma.hbm_to_vmem [thread:$0]  %s3191_s11, 16, %s105_s1, [#allocation12]  }
  0x29   :  { %s2740_s26 = smov [#allocation2]   ;;  %s2741_s0 = smov [#allocation7]  }
  0x2a   :  { %s38_s29 = sshll.u32 %s2740_s26, 4  ;;  %s63_s30 = sshll.u32 %s2741_s0, 4  ;;  %s39_s29 = int_to_ptr.vmem [resolvable:$true] %s38_s29  ;;  %s64_s30 = int_to_ptr.vmem [resolvable:$true] %s63_s30 }
  0x2b   :  { %s2611_s19 = scalar_lea.vmem %s39_s29, 16  ;;  %s2615_s8 = scalar_lea.vmem %s39_s29, 32 }
  0x2c   :  { %p2612_p1 = scmp.ne.s32.totalorder %s39_s29, %s2611_s19  ;;  %p2616_p2 = scmp.lt.s32.totalorder %s39_s29, %s39_s29 }
  0x2d   :  { %p2617_p3 = scmp.lt.s32.totalorder %s2615_s8, %s2611_s19 }
  0x2f   :  { %p2618_p4 = por %p2617_p3, %p2616_p2 }
  0x31   :  { %p2619_p5 = pnand %p2618_p4, %p2612_p1 }
  0x33   :  { %2622 = shalt.err (!%p2619_p5)
}
  0x34   :  { %41 = dma.hbm_to_vmem [thread:$0]  %s3182_s2, 16, %s39_s29, [#allocation3]  }
  0x35   :  { %s2631_s21 = scalar_lea.vmem %s64_s30, 512  ;;  %p2636_p7 = scmp.lt.s32.totalorder %s64_s30, %s64_s30 }
  0x36   :  { %p2632_p6 = scmp.ne.s32.totalorder %s64_s30, %s2631_s21  ;;  %p2637_p8 = scmp.lt.s32.totalorder %s2631_s21, %s2631_s21 }
  0x38   :  { %p2638_p9 = por %p2637_p8, %p2636_p7 }
  0x3a   :  { %p2639_p10 = pnand %p2638_p9, %p2632_p6 }
  0x3c   :  { %2642 = shalt.err (!%p2639_p10)
}
  0x3d   :  { %69 = dma.hbm_to_vmem [thread:$0]  %s3186_s6, 512, %s64_s30, [#allocation6], %s2736_s27, %s2736_s27, %s2737_s28  }
  0x3e   :  { %s2742_s22 = smov [#allocation10]   ;;  %s2743_s23 = smov [#allocation13]  }
  0x3f   :  { %s89_s5 = sshll.u32 %s2742_s22, 4  ;;  %s114_s2 = sshll.u32 %s2743_s23, 4  ;;  %s90_s5 = int_to_ptr.vmem [resolvable:$true] %s89_s5  ;;  %s115_s2 = int_to_ptr.vmem [resolvable:$true] %s114_s2 }
  0x40   :  { %s2651_s24 = scalar_lea.vmem %s90_s5, 512  ;;  %p2656_p12 = scmp.lt.s32.totalorder %s90_s5, %s90_s5 }
  0x41   :  { %p2652_p11 = scmp.ne.s32.totalorder %s90_s5, %s2651_s24  ;;  %p2657_p13 = scmp.lt.s32.totalorder %s2651_s24, %s2651_s24 }
  0x43   :  { %p2658_p0 = por %p2657_p13, %p2656_p12 }
  0x45   :  { %p2659_p1 = pnand %p2658_p0, %p2652_p11 }
  0x47   :  { %2662 = shalt.err (!%p2659_p1)
}
  0x48   :  { %95 = dma.hbm_to_vmem [thread:$0]  %s3189_s9, 512, %s90_s5, [#allocation9], %s2736_s27, %s2736_s27, %s2737_s28  }
  0x49   :  { %s2671_s6 = scalar_lea.vmem %s115_s2, 16  ;;  %s2675_s29 = scalar_lea.vmem %s115_s2, 32 }
  0x4a   :  { %p2672_p2 = scmp.ne.s32.totalorder %s115_s2, %s2671_s6  ;;  %p2676_p3 = scmp.lt.s32.totalorder %s115_s2, %s115_s2 }
  0x4b   :  { %p2677_p4 = scmp.lt.s32.totalorder %s2675_s29, %s2671_s6 }
  0x4d   :  { %p2678_p5 = por %p2677_p4, %p2676_p3 }
  0x4f   :  { %p2679_p6 = pnand %p2678_p5, %p2672_p2 }
  0x51   :  { %2682 = shalt.err (!%p2679_p6)
}
  0x52   :  { %117 = dma.hbm_to_vmem [thread:$0]  %s3192_s12, 16, %s115_s2, [#allocation12]  }
  0x53   :  { %s2744_s19 = smov [#allocation14]  }
  0x54   :  { %s123_s8 = sshll.u32 %s2744_s19, 4  ;;  %s124_s8 = int_to_ptr.vmem [resolvable:$true] %s123_s8 }
  0x55   :  { %s2691_s18 = scalar_lea.vmem %s124_s8, 512  ;;  %p2696_p8 = scmp.lt.s32.totalorder %s124_s8, %s124_s8 }
  0x56   :  { %p2692_p7 = scmp.ne.s32.totalorder %s124_s8, %s2691_s18  ;;  %p2697_p9 = scmp.lt.s32.totalorder %s2691_s18, %s2691_s18 }
  0x58   :  { %p2698_p10 = por %p2697_p9, %p2696_p8 }
  0x5a   :  { %p2699_p11 = pnand %p2698_p10, %p2692_p7 }
  0x5c   :  { %2702 = shalt.err (!%p2699_p11)
}
  0x5d   :  { %129 = dma.hbm_to_vmem [thread:$0]  %s3193_s13, 512, %s124_s8, [#allocation15], %s2736_s27, %s2736_s27, %s2737_s28  }
  0x5e   :  { %2723 = dma.done.wait [#allocation3], 16  }
  0x5f   :  { %2724 = vsyncadd [#allocation3], 4294967280 }
  0x60   :  { %2725 = dma.done.wait [#allocation6], 1024  }
  0x61   :  { %2726 = vsyncadd [#allocation6], 4294966272 }
  0x62   :  { %2727 = dma.done.wait [#allocation9], 768  }
  0x63   :  { %2728 = vsyncadd [#allocation9], 4294966528 }
  0x64   :  { %2729 = dma.done.wait [#allocation12], 32  }
  0x65   :  { %2730 = vsyncadd [#allocation12], 4294967264 }
  0x66   :  { %2731 = dma.done.wait [#allocation15], 512  }
  0x67   :  { %2732 = vsyncadd [#allocation15], 4294966784  ;;  %vm170_vm0 = vcmask 261120   ;;  %s3202_s11 = sld [smem:[#allocation24_spill]]  ;;  %v247_v28 = vld [vmem:[%s3184_s4 + $0x18] sm:$0xff]  ;;  %v246_v29 = vld [vmem:[%s3184_s4 + $0x10] sm:$0xff] }
  0x68   :  { %2307 = vmatprep.subr.mxu0 %v247_v28  ;;  %v245_v30 = vld [vmem:[%s3184_s4 + $0x8] sm:$0xff]  ;;  %s3203_s8 = sld [smem:[#allocation23_spill]]  ;;  %v348_v32 = vld [vmem:[#allocation5 + $0x18] sm:$0xff]  ;;  %v347_v33 = vld [vmem:[#allocation5 + $0x10] sm:$0xff]  ;;  %s2745_s23 = smov 112   ;;  %vm705_vm1 = vcmask 130048  }
  0x69   :  { %2308 = vmatpush3.msra.mxu0 %v247_v28  ;;  %v244_v34 = vld [vmem:[%s3184_s4] sm:$0xff]  ;;  %2321 = vmatprep.subr.mxu1 %v348_v32  ;;  %v346_v35 = vld [vmem:[#allocation5 + $0x8] sm:$0xff]  ;;  %v448_v39 = vld [vmem:[#allocation7 + $0x10] sm:$0xff]  ;;  %vm790_vm2 = vcmask 64512   ;;  %vm2025_vm3 = vcmask 523264  }
  0x6a   :  { %2309 = vmatprep.subr.mxu0 %v246_v29  ;;  %2322 = vmatpush3.msra.mxu1 %v348_v32  ;;  %v449_v37 = vld [vmem:[#allocation7 + $0x18] sm:$0xff]  ;;  %v447_v41 = vld [vmem:[#allocation7 + $0x8] sm:$0xff]  ;;  %v345_v42 = vld [vmem:[#allocation5] sm:$0xff] }
  0x6b   :  { %2310 = vmatpush3.msra.mxu0 %v246_v29  ;;  %2323 = vmatprep.subr.mxu1 %v347_v33  ;;  %v446_v43 = vld [vmem:[#allocation7] sm:$0xff]  ;;  %v2152_v57 = vld [vmem:[#allocation2] ss:$0 sm:$0xff]  ;;  %v619_v29 = vld [vmem:[#allocation8 + $0x8] sm:$0xff] }
  0x6c   :  { %2311 = vmatprep.subr.mxu0 %v245_v30  ;;  %2324 = vmatpush3.msra.mxu1 %v347_v33  ;;  %v2153_v59 = vld [vmem:[%s3183_s3] ss:$0 sm:$0xff]  ;;  %v618_v28 = vld [vmem:[#allocation8] sm:$0xff]  ;;  %s2746_s3 = smov [#allocation16]  }
  0x6d   :  { %v2879_v0 = vld [vmem:[%s3202_s11] sm:$0xff]  ;;  %v2884_v1 = vld [vmem:[%s3202_s11 + $0x10] sm:$0xff]  ;;  %v2889_v2 = vld [vmem:[%s3202_s11 + $0x8] sm:$0xff]  ;;  %2312 = vmatpush3.msra.mxu0 %v245_v30  ;;  %2325 = vmatprep.subr.mxu1 %v346_v35  ;;  %s2136_s5 = sshll.u32 %s2746_s3, 4  ;;  %s2137_s5 = int_to_ptr.vmem [resolvable:$true] %s2136_s5 }
  0x6e   :  { %v171_v3 = vsel %vm170_vm0, %v2879_v0, 0.0  ;;  %v177_v4 = vsel %vm170_vm0, %v2884_v1, 0.0  ;;  %v2898_v5 = vld [vmem:[%s3202_s11 + $0x18] sm:$0xff]  ;;  %v174_v6 = vsel %vm170_vm0, %v2889_v2, 0.0  ;;  %v160_v31 = vld [vmem:[%s3203_s8] sm:$0xff]  ;;  %v161_v36 = vld [vmem:[%s3203_s8 + $0x8] sm:$0xff]  ;;  %2313 = vmatprep.subr.mxu0 %v244_v34  ;;  %2326 = vmatpush3.msra.mxu1 %v346_v35  ;;  %p2708_p13 = scmp.lt.s32.totalorder %s2137_s5, %s2137_s5 }
  0x6f   :  { %172 = vadd.xlane.f32.xlu0 %v171_v3  ;;  %178 = vadd.xlane.f32.xlu1 %v177_v4  ;;  %v180_v7 = vsel %vm170_vm0, %v2898_v5, 0.0  ;;  %v162_v38 = vld [vmem:[%s3203_s8 + $0x10] sm:$0xff]  ;;  %v163_v40 = vld [vmem:[%s3203_s8 + $0x18] sm:$0xff] }
  0x70   :  { %2315 = vmatprep.mubr.msk.f32.mxu0 %vm170_vm0, %v160_v31  ;;  %2314 = vmatpush3.msra.mxu0 %v244_v34 }
  0x71   :  { %2316 = vmatmul.mubr.msk.f32.vlgmr.msra.gmra.mxu0 %vm170_vm0, %v161_v36  ;;  %2335 = vmatprep.subr.mxu0 %v449_v37  ;;  %v2997_v36 = vld [vmem:[#allocation10 + $0x18] sm:$0xff] }
  0x72   :  { %2336 = vmatpush3.msra.mxu0 %v449_v37  ;;  %2318 = vmatprep.mubr.msk.f32.mxu0 %vm170_vm0, %v162_v38  ;;  %v3002_v38 = vld [vmem:[#allocation10 + $0x10] sm:$0xff] }
  0x73   :  { %175 = vadd.xlane.f32.xlu0 %v174_v6  ;;  %181 = vadd.xlane.f32.xlu1 %v180_v7 }
  0x74   :  { %2337 = vmatprep.subr.mxu0 %v448_v39  ;;  %2327 = vmatprep.subr.mxu1 %v345_v42 }
  0x75   :  { %2338 = vmatpush3.msra.mxu0 %v448_v39  ;;  %2328 = vmatpush3.msra.mxu1 %v345_v42 }
  0x76   :  { %2319 = vmatmul.mubr.msk.f32.gmra.mxu0 %vm170_vm0, %v163_v40  ;;  %2339 = vmatprep.subr.mxu0 %v447_v41 }
  0x77   :  { %2340 = vmatpush3.msra.mxu0 %v447_v41 }
  0x78   :  { %2341 = vmatprep.subr.mxu0 %v446_v43 }
  0x79   :  { %2342 = vmatpush3.msra.mxu0 %v446_v43 }
  0xf8   :  { %v173_v8 = vpop.xlane.xlu0 %172  ;;  %v179_v9 = vpop.xlane.xlu1 %178 }
  0xf9   :  { %v184_v10 = vmul.f32 0.03125, %v173_v8  ;;  %v186_v11 = vmul.f32 0.03125, %v179_v9 }
  0xfb   :  { %v2905_v12 = vsub.f32 %v2879_v0, %v184_v10  ;;  %v2908_v13 = vsub.f32 %v2884_v1, %v186_v11 }
  0xfc   :  { %v176_v14 = vpop.xlane.xlu0 %175  ;;  %v182_v15 = vpop.xlane.xlu1 %181 }
  0xfd   :  { %v185_v16 = vmul.f32 0.03125, %v176_v14  ;;  %v187_v17 = vmul.f32 0.03125, %v182_v15  ;;  %v192_v18 = vmul.f32 %v2905_v12, %v2905_v12  ;;  %v194_v19 = vmul.f32 %v2908_v13, %v2908_v13  ;;  %v535_v15 = vld [vmem:[%s3187_s7] sm:$0xff] }
  0xff   :  { %v2915_v20 = vsub.f32 %v2889_v2, %v185_v16  ;;  %v2918_v21 = vsub.f32 %v2898_v5, %v187_v17  ;;  %v196_v22 = vsel %vm170_vm0, %v192_v18, 0.0  ;;  %v202_v23 = vsel %vm170_vm0, %v194_v19, 0.0 }
 0x100   :  { %197 = vadd.xlane.f32.xlu0 %v196_v22 }
 0x101   :  { %v193_v24 = vmul.f32 %v2915_v20, %v2915_v20  ;;  %v195_v25 = vmul.f32 %v2918_v21, %v2918_v21 }
 0x103   :  { %v199_v26 = vsel %vm170_vm0, %v193_v24, 0.0  ;;  %v205_v27 = vsel %vm170_vm0, %v195_v25, 0.0 }
 0x104   :  { %203 = vadd.xlane.f32.xlu0 %v202_v23  ;;  %200 = vadd.xlane.f32.xlu1 %v199_v26 }
 0x108   :  { %206 = vadd.xlane.f32.xlu1 %v205_v27  ;;  %v536_v27 = vld [vmem:[%s3187_s7 + $0x8] sm:$0xff] }
 0x131   :  { %v2317_v14 = vpop.f32.mrf.mxu0 }
 0x133   :  { %v326_v16 = vpop.f32.mrf.mxu0 }
 0x134   :  { %894 = vrot.lane.b32.xlu1 %v326_v16, %s2745_s23 }
 0x136   :  { %v2977_v17 = vpop.f32.mrf.mxu0 }
 0x138   :  { %896 = vrot.lane.b32.xlu1 %v2317_v14, %s2745_s23  ;;  %v2979_v18 = vpop.f32.mrf.mxu0 }
 0x189   :  { %v198_v44 = vpop.xlane.xlu0 %197 }
 0x18a   :  { %v208_v45 = vmul.f32 0.03125, %v198_v44 }
 0x18c   :  { %v212_v46 = vadd.f32 1e-05, %v208_v45 }
 0x18d   :  { %v201_v47 = vpop.xlane.xlu1 %200  ;;  %v204_v48 = vpop.xlane.xlu0 %203 }
 0x18e   :  { %2487 = vrsqrt.f32 %v212_v46  ;;  %v209_v49 = vmul.f32 0.03125, %v201_v47  ;;  %v210_v50 = vmul.f32 0.03125, %v204_v48 }
 0x190   :  { %v213_v51 = vadd.f32 1e-05, %v209_v49  ;;  %v214_v52 = vadd.f32 1e-05, %v210_v50 }
 0x191   :  { %v207_v53 = vpop.xlane.xlu1 %206 }
 0x192   :  { %2489 = vrsqrt.f32 %v213_v51  ;;  %v211_v54 = vmul.f32 0.03125, %v207_v53 }
 0x193   :  { %2491 = vrsqrt.f32 %v214_v52 }
 0x194   :  { %v215_v55 = vadd.f32 1e-05, %v211_v54 }
 0x196   :  { %2493 = vrsqrt.f32 %v215_v55 }
 0x19b   :  { %v2488_v56 = vpop.eup %2487 }
 0x19c   :  { %v220_v58 = vmul.f32 %v2488_v56, %v2905_v12 }
 0x19e   :  { %v230_v60 = vmul.f32 %v2152_v57, %v220_v58 }
 0x19f   :  { %v2490_v61 = vpop.eup %2489 }
 0x1a0   :  { %v2492_v62 = vpop.eup %2491  ;;  %v240_v63 = vadd.f32 %v2153_v59, %v230_v60  ;;  %v221_v3 = vmul.f32 %v2490_v61, %v2915_v20 }
 0x1a1   :  { %v222_v4 = vmul.f32 %v2492_v62, %v2908_v13 }
 0x1a2   :  { %2329 = vmatprep.mubr.msk.f32.mxu1 %vm170_vm0, %v240_v63  ;;  %2343 = vmatprep.mubr.msk.f32.mxu0 %vm170_vm0, %v240_v63  ;;  %v231_v6 = vmul.f32 %v2152_v57, %v221_v3 }
 0x1a3   :  { %v2494_v7 = vpop.eup %2493  ;;  %v232_v8 = vmul.f32 %v2152_v57, %v222_v4 }
 0x1a4   :  { %v241_v9 = vadd.f32 %v2153_v59, %v231_v6  ;;  %v223_v10 = vmul.f32 %v2494_v7, %v2918_v21 }
 0x1a5   :  { %v242_v11 = vadd.f32 %v2153_v59, %v232_v8 }
 0x1a6   :  { %2330 = vmatmul.mubr.msk.f32.vlgmr.msra.gmra.mxu1 %vm170_vm0, %v241_v9  ;;  %2344 = vmatmul.mubr.msk.f32.vlgmr.msra.gmra.mxu0 %vm170_vm0, %v241_v9  ;;  %v233_v12 = vmul.f32 %v2152_v57, %v223_v10  ;;  %v895_v32 = vpop.permute.xlu1 %894 }
 0x1a7   :  { %2332 = vmatprep.mubr.msk.f32.mxu1 %vm170_vm0, %v242_v11  ;;  %2346 = vmatprep.mubr.msk.f32.mxu0 %vm170_vm0, %v242_v11 }
 0x1a8   :  { %v243_v13 = vadd.f32 %v2153_v59, %v233_v12 }
 0x1aa   :  { %2333 = vmatmul.mubr.msk.f32.gmra.mxu1 %vm170_vm0, %v243_v13  ;;  %2347 = vmatmul.mubr.msk.f32.gmra.mxu0 %vm170_vm0, %v243_v13  ;;  %v897_v37 = vpop.permute.xlu1 %896 }
 0x1ab   :  { %2357 = vmatprep.mubr.msk.f32.mxu1 %vm170_vm0, %v535_v15  ;;  %2368 = vmatprep.mubr.msk.f32.mxu0 %vm170_vm0, %v618_v28 }
 0x266   :  { %v2331_v19 = vpop.f32.mrf.mxu1  ;;  %v2345_v20 = vpop.f32.mrf.mxu0 }
 0x268   :  { %v427_v21 = vpop.f32.mrf.mxu1  ;;  %v516_v22 = vpop.f32.mrf.mxu0 }
 0x26a   :  { %v2334_v23 = vpop.f32.mrf.mxu1  ;;  %v2348_v24 = vpop.f32.mrf.mxu0 }
 0x26b   :  { %2349 = vmatprep.subr.mxu1 %v2334_v23  ;;  %2360 = vmatprep.subr.mxu0 %v2348_v24 }
 0x26c   :  { %v437_v25 = vpop.f32.mrf.mxu1  ;;  %v526_v26 = vpop.f32.mrf.mxu0  ;;  %2350 = vmatpush3.msra.mxu1 %v2334_v23  ;;  %2361 = vmatpush3.msra.mxu0 %v2348_v24  ;;  %v3031_v23 = vld [vmem:[#allocation10] sm:$0xff] }
 0x26d   :  { %2351 = vmatprep.subr.mxu1 %v437_v25  ;;  %2362 = vmatprep.subr.mxu0 %v526_v26 }
 0x26e   :  { %2352 = vmatpush3.msra.mxu1 %v437_v25  ;;  %2363 = vmatpush3.msra.mxu0 %v526_v26 }
 0x26f   :  { %2353 = vmatprep.subr.mxu1 %v2331_v19  ;;  %2364 = vmatprep.subr.mxu0 %v2345_v20 }
 0x270   :  { %2354 = vmatpush3.msra.mxu1 %v2331_v19  ;;  %2365 = vmatpush3.msra.mxu0 %v2345_v20 }
 0x271   :  { %2355 = vmatprep.subr.mxu1 %v427_v21  ;;  %2366 = vmatprep.subr.mxu0 %v516_v22 }
 0x272   :  { %2356 = vmatpush3.msra.mxu1 %v427_v21  ;;  %2367 = vmatpush3.msra.mxu0 %v516_v22 }
 0x273   :  { %2358 = vmatmul.mubr.msk.f32.vlgmr.msra.gmra.mxu1 %vm170_vm0, %v536_v27  ;;  %2369 = vmatmul.mubr.msk.f32.vlgmr.msra.gmra.mxu0 %vm170_vm0, %v619_v29 }
 0x274   :  { %2373 = vmatprep.mubr.msk.f32.mxu0 %vm705_vm1, %v326_v16  ;;  %v3027_v16 = vld [vmem:[#allocation10 + $0x8] sm:$0xff] }
 0x333   :  { %v2988_v30 = vpop.f32.mrf.mxu1  ;;  %v2995_v33 = vpop.f32.mrf.mxu0 }
 0x335   :  { %v609_v31 = vpop.f32.mrf.mxu1  ;;  %v692_v34 = vpop.f32.mrf.mxu0 }
 0x336   :  { %898 = vrot.lane.b32.xlu0 %v609_v31, %s2745_s23  ;;  %2371 = vmatprep.subr.msk.mxu0 %vm705_vm1, %v609_v31 }
 0x337   :  { %2372 = vmatpush3.xpose.msk.msra.mxu0 %vm705_vm1, %v609_v31  ;;  %2376 = vmatprep.subr.mxu1 %v692_v34 }
 0x338   :  { %2377 = vmatpush3.msra.mxu1 %v692_v34 }
 0x33a   :  { %2374 = vmatmul.mubr.msk.f32.vlgmr.msra.gmra.mxu0 %vm705_vm1, %v2317_v14 }
 0x33b   :  { %2383 = vmatprep.mubr.msk.f32.mxu0 %vm705_vm1, %v895_v32 }
 0x3a8   :  { %v899_v35 = vpop.permute.xlu0 %898 }
 0x3a9   :  { %2381 = vmatprep.subr.msk.mxu0 %vm705_vm1, %v899_v35 }
 0x3aa   :  { %2382 = vmatpush3.xpose.msk.msra.mxu0 %vm705_vm1, %v899_v35 }
 0x3ab   :  { %2391 = vmatprep.subr.mxu0 %v2997_v36 }
 0x3ad   :  { %2384 = vmatmul.mubr.msk.f32.vlgmr.msra.gmra.mxu0 %vm705_vm1, %v897_v37 }
 0x3ae   :  { %2392 = vmatpush3.msra.mxu0 %v2997_v36 }
 0x3af   :  { %2393 = vmatprep.subr.mxu0 %v3002_v38 }
 0x3b0   :  { %2394 = vmatpush3.msra.mxu0 %v3002_v38 }
 0x3b1   :  { %2405 = vmatprep.subr.msk.mxu0 %vm705_vm1, %v2988_v30 }
 0x3fa   :  { %v2375_v39 = vpop.f32.mrf.mxu0 }
 0x3fb   :  { %v794_v40 = vsel %vm790_vm2, %v2375_v39, -inf }
 0x3fc   :  { %795 = vmax.xlane.f32.xlu0 %v794_v40  ;;  %v781_v41 = vpop.f32.mrf.mxu0 }
 0x3fd   :  { %v791_v42 = vsel %vm790_vm2, %v781_v41, -inf }
 0x3fe   :  { %792 = vmax.xlane.f32.xlu1 %v791_v42 }
 0x46d   :  { %v2385_v43 = vpop.f32.mrf.mxu0 }
 0x46e   :  { %v984_v46 = vsel %vm790_vm2, %v2385_v43, -inf }
 0x46f   :  { %v972_v44 = vpop.f32.mrf.mxu0 }
 0x470   :  { %v981_v45 = vsel %vm790_vm2, %v972_v44, -inf }
 0x471   :  { %982 = vmax.xlane.f32.xlu0 %v981_v45 }
 0x475   :  { %985 = vmax.xlane.f32.xlu0 %v984_v46 }
 0x485   :  { %v796_v47 = vpop.xlane.xlu0 %795 }
 0x486   :  { %v798_v48 = vsub.f32 %v2375_v39, %v796_v47 }
 0x487   :  { %v793_v49 = vpop.xlane.xlu1 %792 }
 0x488   :  { %v801_v50 = vmul.f32 1.442695, %v798_v48  ;;  %v797_v51 = vsub.f32 %v781_v41, %v793_v49 }
 0x48a   :  { %2495 = vpow2.f32 %v801_v50  ;;  %v799_v52 = vmul.f32 1.442695, %v797_v51 }
 0x48c   :  { %2497 = vpow2.f32 %v799_v52 }
 0x497   :  { %v2496_v53 = vpop.eup %2495 }
 0x498   :  { %v806_v54 = vsel %vm790_vm2, %v2496_v53, 0.0 }
 0x499   :  { %v2498_v55 = vpop.eup %2497  ;;  %807 = vadd.xlane.f32.xlu0 %v806_v54 }
 0x49a   :  { %v803_v56 = vsel %vm790_vm2, %v2498_v55, 0.0 }
 0x49b   :  { %804 = vadd.xlane.f32.xlu1 %v803_v56 }
 0x4fa   :  { %v983_v57 = vpop.xlane.xlu0 %982 }
 0x4fb   :  { %v987_v58 = vsub.f32 %v972_v44, %v983_v57 }
 0x4fd   :  { %v989_v59 = vmul.f32 1.442695, %v987_v58 }
 0x4fe   :  { %v986_v60 = vpop.xlane.xlu0 %985 }
 0x4ff   :  { %2499 = vpow2.f32 %v989_v59  ;;  %v988_v61 = vsub.f32 %v2385_v43, %v986_v60  ;;  %v3066_v60 = vld [vmem:[%s3190_s10] ss:$0 sm:$0xff] }
 0x501   :  { %v991_v62 = vmul.f32 1.442695, %v988_v61 }
 0x503   :  { %2501 = vpow2.f32 %v991_v62 }
 0x50c   :  { %v2500_v63 = vpop.eup %2499 }
 0x50d   :  { %v993_v3 = vsel %vm790_vm2, %v2500_v63, 0.0 }
 0x50e   :  { %994 = vadd.xlane.f32.xlu1 %v993_v3 }
 0x510   :  { %v2502_v4 = vpop.eup %2501 }
 0x511   :  { %v996_v6 = vsel %vm790_vm2, %v2502_v4, 0.0 }
 0x512   :  { %997 = vadd.xlane.f32.xlu0 %v996_v6 }
 0x51f   :  { %1004 = vrot.lane.b32.xlu1 %v692_v34, %s2745_s23 }
 0x522   :  { %v808_v7 = vpop.xlane.xlu0 %807 }
 0x523   :  { %1437 = vrot.lane.b32.xlu1 %v2979_v18, %s2745_s23  ;;  %2503 = vrcp.f32 %v808_v7 }
 0x524   :  { %v805_v8 = vpop.xlane.xlu1 %804 }
 0x525   :  { %2505 = vrcp.f32 %v805_v8 }
 0x527   :  { %1439 = vrot.lane.b32.xlu1 %v2977_v17, %s2745_s23 }
 0x528   :  { %1441 = vrot.lane.b32.xlu0 %v2988_v30, %s2745_s23 }
 0x530   :  { %v2504_v9 = vpop.eup %2503 }
 0x531   :  { %v812_v12 = vmul.f32 %v2504_v9, %v2496_v53 }
 0x532   :  { %v2506_v10 = vpop.eup %2505 }
 0x533   :  { %v811_v11 = vmul.f32 %v2506_v10, %v2498_v55 }
 0x535   :  { %2378 = vmatprep.mubr.msk.f32.mxu1 %vm790_vm2, %v811_v11 }
 0x536   :  { %2379 = vmatmul.mubr.msk.f32.vlgmr.msra.gmra.mxu1 %vm790_vm2, %v812_v12 }
 0x597   :  { %v995_v13 = vpop.xlane.xlu1 %994 }
 0x598   :  { %2507 = vrcp.f32 %v995_v13 }
 0x59b   :  { %v998_v14 = vpop.xlane.xlu0 %997  ;;  %v1005_v15 = vpop.permute.xlu1 %1004 }
 0x59c   :  { %2509 = vrcp.f32 %v998_v14  ;;  %2386 = vmatprep.subr.mxu1 %v1005_v15 }
 0x59d   :  { %2387 = vmatpush3.msra.mxu1 %v1005_v15 }
 0x59e   :  { %2398 = vmatprep.subr.mxu1 %v3027_v16 }
 0x59f   :  { %v1442_v28 = vpop.permute.xlu0 %1441  ;;  %v1438_v29 = vpop.permute.xlu1 %1437 }
 0x5a3   :  { %v1440_v31 = vpop.permute.xlu1 %1439 }
 0x5a5   :  { %v2508_v19 = vpop.eup %2507 }
 0x5a6   :  { %v1001_v20 = vmul.f32 %v2508_v19, %v2500_v63 }
 0x5a8   :  { %2388 = vmatprep.mubr.msk.f32.mxu1 %vm790_vm2, %v1001_v20 }
 0x5a9   :  { %v2510_v21 = vpop.eup %2509 }
 0x5aa   :  { %v1002_v22 = vmul.f32 %v2510_v21, %v2502_v4 }
 0x5ac   :  { %2389 = vmatmul.mubr.msk.f32.vlgmr.msra.gmra.mxu1 %vm790_vm2, %v1002_v22 }
 0x5ad   :  { %2399 = vmatpush3.msra.mxu1 %v3027_v16 }
 0x5ae   :  { %2400 = vmatprep.subr.mxu1 %v3031_v23 }
 0x5af   :  { %2401 = vmatpush3.msra.mxu1 %v3031_v23 }
 0x5b0   :  { %2410 = vmatprep.subr.mxu1 %v2995_v33 }
 0x5f6   :  { %v2380_v24 = vpop.f32.mrf.mxu1 }
 0x5f8   :  { %v885_v25 = vpop.f32.mrf.mxu1 }
 0x5f9   :  { %2402 = vmatprep.mubr.msk.f32.mxu1 %vm705_vm1, %v885_v25 }
 0x5fa   :  { %2403 = vmatmul.mubr.msk.f32.vlgmr.msra.gmra.mxu1 %vm705_vm1, %v2380_v24 }
 0x5fb   :  { %2411 = vmatpush3.msra.mxu1 %v2995_v33 }
 0x66c   :  { %v2390_v26 = vpop.f32.mrf.mxu1 }
 0x66e   :  { %v1079_v27 = vpop.f32.mrf.mxu1 }
 0x66f   :  { %2395 = vmatprep.mubr.msk.f32.mxu0 %vm705_vm1, %v1079_v27 }
 0x670   :  { %2396 = vmatmul.mubr.msk.f32.vlgmr.msra.gmra.mxu0 %vm705_vm1, %v2390_v26 }
 0x671   :  { %2406 = vmatpush3.xpose.msk.msra.mxu0 %vm705_vm1, %v2988_v30  ;;  %2407 = vmatprep.mubr.msk.f32.mxu0 %vm705_vm1, %v2979_v18 }
 0x672   :  { %2415 = vmatprep.subr.msk.mxu0 %vm705_vm1, %v1442_v28 }
 0x674   :  { %2408 = vmatmul.mubr.msk.f32.vlgmr.msra.gmra.mxu0 %vm705_vm1, %v2977_v17 }
 0x675   :  { %2416 = vmatpush3.xpose.msk.msra.mxu0 %vm705_vm1, %v1442_v28  ;;  %2417 = vmatprep.mubr.msk.f32.mxu0 %vm705_vm1, %v1438_v29 }
 0x676   :  { %2425 = vmatprep.subr.mxu0 %v2997_v36 }
 0x678   :  { %2418 = vmatmul.mubr.msk.f32.vlgmr.msra.gmra.mxu0 %vm705_vm1, %v1440_v31 }
 0x679   :  { %2426 = vmatpush3.msra.mxu0 %v2997_v36 }
 0x67a   :  { %2427 = vmatprep.subr.mxu0 %v3002_v38 }
 0x67b   :  { %2428 = vmatpush3.msra.mxu0 %v3002_v38 }
 0x6ba   :  { %v2404_v52 = vpop.f32.mrf.mxu1 }
 0x6bc   :  { %v1241_v56 = vpop.f32.mrf.mxu1 }
 0x730   :  { %v2397_v18 = vpop.f32.mrf.mxu0 }
 0x731   :  { %v1247_v61 = vadd.f32 %v2404_v52, %v2397_v18 }
 0x732   :  { %v1160_v30 = vpop.f32.mrf.mxu0 }
 0x733   :  { %v1242_v57 = vadd.f32 %v1241_v56, %v1160_v30  ;;  %v1801_v4 = vadd.f32 %v3066_v60, %v1247_v61 }
 0x734   :  { %v2409_v32 = vpop.f32.mrf.mxu0 }
 0x735   :  { %v1337_v17 = vsel %vm790_vm2, %v2409_v32, -inf  ;;  %v1800_v62 = vadd.f32 %v3066_v60, %v1242_v57  ;;  %v3076_v8 = vadd.f32 %v1801_v4, %v2889_v2  ;;  %v1885_v57 = vld [vmem:[#allocation14 + $0x18] sm:$0xff] }
 0x736   :  { %1338 = vmax.xlane.f32.xlu0 %v1337_v17  ;;  %v1325_v34 = vpop.f32.mrf.mxu0  ;;  %2439 = vmatprep.subr.mxu0 %v1885_v57 }
 0x737   :  { %v1334_v35 = vsel %vm790_vm2, %v1325_v34, -inf  ;;  %v3072_v6 = vadd.f32 %v1800_v62, %v2879_v0  ;;  %v1813_v10 = vsel %vm170_vm0, %v3076_v8, 0.0 }
 0x738   :  { %1335 = vmax.xlane.f32.xlu1 %v1334_v35  ;;  %v2419_v37 = vpop.f32.mrf.mxu0 }
 0x739   :  { %v1527_v36 = vsel %vm790_vm2, %v2419_v37, -inf  ;;  %v1810_v9 = vsel %vm170_vm0, %v3072_v6, 0.0 }
 0x73a   :  { %v1515_v39 = vpop.f32.mrf.mxu0 }
 0x73b   :  { %v1524_v40 = vsel %vm790_vm2, %v1515_v39, -inf }
 0x73c   :  { %1525 = vmax.xlane.f32.xlu0 %v1524_v40  ;;  %v3099_v40 = vld [vmem:[#allocation13] ss:$0 sm:$0xff] }
 0x740   :  { %1528 = vmax.xlane.f32.xlu0 %v1527_v36 }
 0x7bf   :  { %v1339_v41 = vpop.xlane.xlu0 %1338 }
 0x7c0   :  { %v1341_v38 = vsub.f32 %v2409_v32, %v1339_v41 }
 0x7c1   :  { %v1336_v42 = vpop.xlane.xlu1 %1335 }
 0x7c2   :  { %v1344_v43 = vmul.f32 1.442695, %v1341_v38  ;;  %v1340_v44 = vsub.f32 %v1325_v34, %v1336_v42 }
 0x7c4   :  { %2511 = vpow2.f32 %v1344_v43  ;;  %v1342_v45 = vmul.f32 1.442695, %v1340_v44 }
 0x7c5   :  { %v1526_v46 = vpop.xlane.xlu0 %1525 }
 0x7c6   :  { %2513 = vpow2.f32 %v1342_v45  ;;  %v1530_v47 = vsub.f32 %v1515_v39, %v1526_v46 }
 0x7c8   :  { %v1532_v48 = vmul.f32 1.442695, %v1530_v47 }
 0x7c9   :  { %v1529_v49 = vpop.xlane.xlu0 %1528 }
 0x7ca   :  { %2515 = vpow2.f32 %v1532_v48  ;;  %v1531_v50 = vsub.f32 %v2419_v37, %v1529_v49  ;;  %v3095_v37 = vld [vmem:[#allocation11] ss:$0 sm:$0xff] }
 0x7cc   :  { %v1534_v51 = vmul.f32 1.442695, %v1531_v50 }
 0x7ce   :  { %2517 = vpow2.f32 %v1534_v51 }
 0x7d1   :  { %v2512_v53 = vpop.eup %2511 }
 0x7d2   :  { %v1349_v54 = vsel %vm790_vm2, %v2512_v53, 0.0 }
 0x7d3   :  { %v2514_v55 = vpop.eup %2513  ;;  %1350 = vadd.xlane.f32.xlu0 %v1349_v54 }
 0x7d4   :  { %v1346_v58 = vsel %vm790_vm2, %v2514_v55, 0.0 }
 0x7d5   :  { %1347 = vadd.xlane.f32.xlu1 %v1346_v58  ;;  %v1883_v58 = vld [vmem:[#allocation14 + $0x8] sm:$0xff] }
 0x7d7   :  { %v2516_v59 = vpop.eup %2515 }
 0x7d8   :  { %v1536_v63 = vsel %vm790_vm2, %v2516_v59, 0.0 }
 0x7d9   :  { %1537 = vadd.xlane.f32.xlu1 %v1536_v63 }
 0x7db   :  { %v2518_v3 = vpop.eup %2517 }
 0x7dc   :  { %v1539_v7 = vsel %vm790_vm2, %v2518_v3, 0.0 }
 0x7dd   :  { %1540 = vadd.xlane.f32.xlu0 %v1539_v7 }
 0x7e1   :  { %1811 = vadd.xlane.f32.xlu0 %v1810_v9 }
 0x7e5   :  { %1814 = vadd.xlane.f32.xlu0 %v1813_v10 }
 0x7ea   :  { %1547 = vrot.lane.b32.xlu1 %v2995_v33, %s2745_s23 }
 0x85c   :  { %v1351_v11 = vpop.xlane.xlu0 %1350 }
 0x85d   :  { %2519 = vrcp.f32 %v1351_v11 }
 0x85e   :  { %v1348_v0 = vpop.xlane.xlu1 %1347 }
 0x85f   :  { %2521 = vrcp.f32 %v1348_v0 }
 0x862   :  { %v1538_v12 = vpop.xlane.xlu1 %1537 }
 0x863   :  { %2523 = vrcp.f32 %v1538_v12 }
 0x866   :  { %v1541_v13 = vpop.xlane.xlu0 %1540  ;;  %v1548_v2 = vpop.permute.xlu1 %1547 }
 0x867   :  { %2525 = vrcp.f32 %v1541_v13  ;;  %2420 = vmatprep.subr.mxu1 %v1548_v2 }
 0x86a   :  { %v1812_v14 = vpop.xlane.xlu0 %1811  ;;  %v2520_v15 = vpop.eup %2519 }
 0x86b   :  { %v1822_v19 = vmul.f32 0.03125, %v1812_v14  ;;  %v1355_v24 = vmul.f32 %v2520_v15, %v2512_v53 }
 0x86c   :  { %v2522_v20 = vpop.eup %2521 }
 0x86d   :  { %v1826_v21 = vsub.f32 %v3072_v6, %v1822_v19  ;;  %v1354_v22 = vmul.f32 %v2522_v20, %v2514_v55  ;;  %v2017_v19 = vld [vmem:[%s3195_s15 + $0x38] sm:$0xff]  ;;  %v2016_v20 = vld [vmem:[%s3195_s15 + $0x30] sm:$0xff] }
 0x86e   :  { %v1815_v42 = vpop.xlane.xlu0 %1814 }
 0x86f   :  { %2412 = vmatprep.mubr.msk.f32.mxu1 %vm790_vm2, %v1354_v22  ;;  %v1830_v33 = vmul.f32 %v1826_v21, %v1826_v21  ;;  %v1823_v47 = vmul.f32 0.03125, %v1815_v42  ;;  %v2014_v22 = vld [vmem:[%s3195_s15 + $0x20] sm:$0xff] }
 0x870   :  { %v2524_v25 = vpop.eup %2523  ;;  %2413 = vmatmul.mubr.msk.f32.vlgmr.msra.gmra.mxu1 %vm790_vm2, %v1355_v24  ;;  %v2013_v24 = vld [vmem:[%s3195_s15 + $0x18] sm:$0xff] }
 0x871   :  { %2421 = vmatpush3.msra.mxu1 %v1548_v2  ;;  %v1834_v26 = vsel %vm170_vm0, %v1830_v33, 0.0  ;;  %v1544_v27 = vmul.f32 %v2524_v25, %v2516_v59  ;;  %v1827_v51 = vsub.f32 %v3076_v8, %v1823_v47  ;;  %v2012_v33 = vld [vmem:[%s3195_s15 + $0x10] sm:$0xff]  ;;  %v2011_v25 = vld [vmem:[%s3195_s15 + $0x8] sm:$0xff] }
 0x872   :  { %1835 = vadd.xlane.f32.xlu1 %v1834_v26  ;;  %2432 = vmatprep.subr.mxu1 %v3027_v16  ;;  %v2010_v26 = vld [vmem:[%s3195_s15] sm:$0xff] }
 0x873   :  { %2422 = vmatprep.mubr.msk.f32.mxu1 %vm790_vm2, %v1544_v27  ;;  %v1831_v55 = vmul.f32 %v1827_v51, %v1827_v51 }
 0x874   :  { %v2526_v28 = vpop.eup %2525 }
 0x875   :  { %v1545_v29 = vmul.f32 %v2526_v28, %v2518_v3  ;;  %v1837_v56 = vsel %vm170_vm0, %v1831_v55, 0.0 }
 0x877   :  { %2423 = vmatmul.mubr.msk.f32.vlgmr.msra.gmra.mxu1 %vm790_vm2, %v1545_v29 }
 0x878   :  { %2433 = vmatpush3.msra.mxu1 %v3027_v16 }
 0x879   :  { %2434 = vmatprep.subr.mxu1 %v3031_v23 }
 0x87a   :  { %2435 = vmatpush3.msra.mxu1 %v3031_v23 }
 0x87b   :  { %2453 = vmatprep.subr.mxu1 %v2017_v19 }
 0x8fb   :  { %v1836_v31 = vpop.xlane.xlu1 %1835 }
 0x8fc   :  { %v1846_v18 = vmul.f32 0.03125, %v1836_v31 }
 0x8fe   :  { %v1850_v30 = vadd.f32 1e-05, %v1846_v18 }
 0x900   :  { %2527 = vrsqrt.f32 %v1850_v30 }
 0x90d   :  { %v2528_v32 = vpop.eup %2527 }
 0x90e   :  { %v1858_v35 = vmul.f32 %v2528_v32, %v1826_v21  ;;  %v2015_v21 = vld [vmem:[%s3195_s15 + $0x28] sm:$0xff] }
 0x910   :  { %v1868_v16 = vmul.f32 %v3095_v37, %v1858_v35 }
 0x912   :  { %v1878_v36 = vadd.f32 %v3099_v40, %v1868_v16 }
 0x930   :  { %v2414_v17 = vpop.f32.mrf.mxu1 }
 0x932   :  { %v1428_v34 = vpop.f32.mrf.mxu1 }
 0x933   :  { %2436 = vmatprep.mubr.msk.f32.mxu1 %vm705_vm1, %v1428_v34 }
 0x934   :  { %2437 = vmatmul.mubr.msk.f32.vlgmr.msra.gmra.mxu1 %vm705_vm1, %v2414_v17 }
 0x935   :  { %2454 = vmatpush3.msra.mxu1 %v2017_v19 }
 0x936   :  { %2455 = vmatprep.subr.mxu1 %v2016_v20 }
 0x937   :  { %v2424_v39 = vpop.f32.mrf.mxu1  ;;  %2456 = vmatpush3.msra.mxu1 %v2016_v20 }
 0x938   :  { %2457 = vmatprep.subr.mxu1 %v2015_v21 }
 0x939   :  { %v1622_v23 = vpop.f32.mrf.mxu1  ;;  %2458 = vmatpush3.msra.mxu1 %v2015_v21 }
 0x93a   :  { %2429 = vmatprep.mubr.msk.f32.mxu0 %vm705_vm1, %v1622_v23  ;;  %2459 = vmatprep.subr.mxu1 %v2014_v22 }
 0x93b   :  { %2430 = vmatmul.mubr.msk.f32.vlgmr.msra.gmra.mxu0 %vm705_vm1, %v2424_v39  ;;  %2460 = vmatpush3.msra.mxu1 %v2014_v22 }
 0x93c   :  { %2447 = vmatprep.mubr.msk.f32.mxu0 %vm170_vm0, %v1878_v36  ;;  %2440 = vmatpush3.msra.mxu0 %v1885_v57 }
 0x93d   :  { %2461 = vmatprep.subr.mxu1 %v2013_v24 }
 0x93e   :  { %2462 = vmatpush3.msra.mxu1 %v2013_v24 }
 0x93f   :  { %2463 = vmatprep.subr.mxu1 %v2012_v33 }
 0x940   :  { %2464 = vmatpush3.msra.mxu1 %v2012_v33 }
 0x941   :  { %2465 = vmatprep.subr.mxu1 %v2011_v25 }
 0x942   :  { %2466 = vmatpush3.msra.mxu1 %v2011_v25 }
 0x943   :  { %2467 = vmatprep.subr.mxu1 %v2010_v26 }
 0x944   :  { %2468 = vmatpush3.msra.mxu1 %v2010_v26 }
 0x9f4   :  { %v2438_v41 = vpop.f32.mrf.mxu1 }
 0x9f6   :  { %v1784_v44 = vpop.f32.mrf.mxu1 }
 0x9fb   :  { %v2431_v38 = vpop.f32.mrf.mxu0 }
 0x9fc   :  { %v1790_v43 = vadd.f32 %v2438_v41, %v2431_v38  ;;  %v2201_v41 = vld [vmem:[%s3194_s14] ss:$0 sm:$0xff] }
 0x9fd   :  { %v1703_v45 = vpop.f32.mrf.mxu0 }
 0x9fe   :  { %v1785_v46 = vadd.f32 %v1784_v44, %v1703_v45  ;;  %v1803_v48 = vadd.f32 %v3066_v60, %v1790_v43 }
 0xa00   :  { %v1802_v49 = vadd.f32 %v3066_v60, %v1785_v46  ;;  %v3112_v52 = vadd.f32 %v1803_v48, %v2898_v5  ;;  %v1882_v5 = vld [vmem:[#allocation14] sm:$0xff] }
 0xa02   :  { %v3108_v50 = vadd.f32 %v1802_v49, %v2884_v1  ;;  %v1819_v54 = vsel %vm170_vm0, %v3112_v52, 0.0  ;;  %v1884_v1 = vld [vmem:[#allocation14 + $0x10] sm:$0xff] }
 0xa03   :  { %2441 = vmatprep.subr.mxu0 %v1884_v1 }
 0xa04   :  { %v1816_v53 = vsel %vm170_vm0, %v3108_v50, 0.0  ;;  %2442 = vmatpush3.msra.mxu0 %v1884_v1 }
 0xa05   :  { %1817 = vadd.xlane.f32.xlu0 %v1816_v53  ;;  %2443 = vmatprep.subr.mxu0 %v1883_v58 }
 0xa06   :  { %2444 = vmatpush3.msra.mxu0 %v1883_v58 }
 0xa07   :  { %2445 = vmatprep.subr.mxu0 %v1882_v5 }
 0xa08   :  { %2446 = vmatpush3.msra.mxu0 %v1882_v5 }
 0xa09   :  { %1820 = vadd.xlane.f32.xlu0 %v1819_v54 }
 0xa0d   :  { %1838 = vadd.xlane.f32.xlu0 %v1837_v56 }
 0xa8e   :  { %v1818_v59 = vpop.xlane.xlu0 %1817 }
 0xa8f   :  { %v1824_v60 = vmul.f32 0.03125, %v1818_v59 }
 0xa91   :  { %v1828_v61 = vsub.f32 %v3108_v50, %v1824_v60 }
 0xa92   :  { %v1821_v62 = vpop.xlane.xlu0 %1820 }
 0xa93   :  { %v1825_v63 = vmul.f32 0.03125, %v1821_v62  ;;  %v1832_v3 = vmul.f32 %v1828_v61, %v1828_v61 }
 0xa95   :  { %v1829_v4 = vsub.f32 %v3112_v52, %v1825_v63  ;;  %v1840_v7 = vsel %vm170_vm0, %v1832_v3, 0.0 }
 0xa96   :  { %1841 = vadd.xlane.f32.xlu0 %v1840_v7  ;;  %v1839_v9 = vpop.xlane.xlu0 %1838 }
 0xa97   :  { %v1847_v10 = vmul.f32 0.03125, %v1839_v9  ;;  %v1833_v11 = vmul.f32 %v1829_v4, %v1829_v4  ;;  %v2206_v9 = vld [vmem:[%s3196_s16] ss:$0 sm:$0xff]  ;;  %s2703_s16 = scalar_lea.vmem %s2137_s5, 512 }
 0xa98   :  { %p2704_p12 = scmp.ne.s32.totalorder %s2137_s5, %s2703_s16  ;;  %p2709_p0 = scmp.lt.s32.totalorder %s2703_s16, %s2703_s16 }
 0xa99   :  { %v1851_v0 = vadd.f32 1e-05, %v1847_v10  ;;  %v1843_v12 = vsel %vm170_vm0, %v1833_v11, 0.0 }
 0xa9a   :  { %1844 = vadd.xlane.f32.xlu0 %v1843_v12  ;;  %p2710_p1 = por %p2709_p0, %p2708_p13 }
 0xa9b   :  { %2529 = vrsqrt.f32 %v1851_v0 }
 0xa9c   :  { %p2711_p2 = pnand %p2710_p1, %p2704_p12 }
 0xaa8   :  { %v2530_v13 = vpop.eup %2529 }
 0xaa9   :  { %v1859_v2 = vmul.f32 %v2530_v13, %v1827_v51 }
 0xaab   :  { %v1869_v14 = vmul.f32 %v3095_v37, %v1859_v2 }
 0xaad   :  { %v1879_v15 = vadd.f32 %v3099_v40, %v1869_v14 }
 0xaaf   :  { %2448 = vmatmul.mubr.msk.f32.vlgmr.msra.gmra.mxu0 %vm170_vm0, %v1879_v15 }
 0xb1f   :  { %v1842_v27 = vpop.xlane.xlu0 %1841 }
 0xb20   :  { %v1848_v28 = vmul.f32 0.03125, %v1842_v27 }
 0xb22   :  { %v1852_v29 = vadd.f32 1e-05, %v1848_v28 }
 0xb23   :  { %v1845_v31 = vpop.xlane.xlu0 %1844 }
 0xb24   :  { %2531 = vrsqrt.f32 %v1852_v29  ;;  %v1849_v18 = vmul.f32 0.03125, %v1845_v31 }
 0xb26   :  { %v1853_v30 = vadd.f32 1e-05, %v1849_v18 }
 0xb28   :  { %2533 = vrsqrt.f32 %v1853_v30 }
 0xb31   :  { %v2532_v32 = vpop.eup %2531 }
 0xb32   :  { %v1860_v17 = vmul.f32 %v2532_v32, %v1828_v61 }
 0xb34   :  { %v1870_v34 = vmul.f32 %v3095_v37, %v1860_v17 }
 0xb35   :  { %v2534_v35 = vpop.eup %2533 }
 0xb36   :  { %v1880_v16 = vadd.f32 %v3099_v40, %v1870_v34  ;;  %v1861_v39 = vmul.f32 %v2534_v35, %v1829_v4 }
 0xb38   :  { %2450 = vmatprep.mubr.msk.f32.mxu0 %vm170_vm0, %v1880_v16  ;;  %v1871_v23 = vmul.f32 %v3095_v37, %v1861_v39 }
 0xb3a   :  { %v1881_v36 = vadd.f32 %v3099_v40, %v1871_v23 }
 0xb3c   :  { %2451 = vmatmul.mubr.msk.f32.gmra.mxu0 %vm170_vm0, %v1881_v36 }
 0xb6f   :  { %v2449_v38 = vpop.f32.mrf.mxu0 }
 0xb70   :  { %v1977_v42 = vadd.f32 %v2449_v38, %v2201_v41 }
 0xb71   :  { %v1971_v43 = vpop.f32.mrf.mxu0 }
 0xb72   :  { %v1995_v44 = vmul.f32 0.70710677, %v1977_v42  ;;  %v1972_v45 = vadd.f32 %v2201_v41, %v1971_v43  ;;  %v1991_v40 = vmul.f32 0.5, %v1977_v42 }
 0xb74   :  { %2535 = verf.f32 %v1995_v44  ;;  %v1994_v46 = vmul.f32 0.70710677, %v1972_v45  ;;  %v1990_v37 = vmul.f32 0.5, %v1972_v45 }
 0xb76   :  { %2537 = verf.f32 %v1994_v46 }
 0xb81   :  { %v2536_v47 = vpop.eup %2535 }
 0xb82   :  { %v2003_v49 = vadd.f32 1.0, %v2536_v47 }
 0xb83   :  { %v2538_v48 = vpop.eup %2537 }
 0xb84   :  { %v2002_v51 = vadd.f32 1.0, %v2538_v48  ;;  %v2007_v54 = vmul.f32 %v2003_v49, %v1991_v40 }
 0xb86   :  { %v2006_v53 = vmul.f32 %v2002_v51, %v1990_v37 }
 0xb88   :  { %2469 = vmatprep.mubr.msk.f32.mxu1 %vm2025_vm3, %v2006_v53 }
 0xb89   :  { %2470 = vmatmul.mubr.msk.f32.vlgmr.msra.gmra.mxu1 %vm2025_vm3, %v2007_v54 }
 0xbfc   :  { %v2452_v55 = vpop.f32.mrf.mxu0 }
 0xbfd   :  { %v1987_v56 = vadd.f32 %v2452_v55, %v2201_v41 }
 0xbfe   :  { %v1981_v57 = vpop.f32.mrf.mxu0 }
 0xbff   :  { %v1997_v1 = vmul.f32 0.70710677, %v1987_v56  ;;  %v1982_v58 = vadd.f32 %v2201_v41, %v1981_v57  ;;  %v1993_v3 = vmul.f32 0.5, %v1987_v56 }
 0xc01   :  { %2539 = verf.f32 %v1997_v1  ;;  %v1996_v5 = vmul.f32 0.70710677, %v1982_v58  ;;  %v1992_v62 = vmul.f32 0.5, %v1982_v58 }
 0xc03   :  { %2541 = verf.f32 %v1996_v5 }
 0xc0e   :  { %v2540_v59 = vpop.eup %2539 }
 0xc0f   :  { %v2005_v61 = vadd.f32 1.0, %v2540_v59 }
 0xc10   :  { %v2542_v60 = vpop.eup %2541 }
 0xc11   :  { %v2004_v63 = vadd.f32 1.0, %v2542_v60  ;;  %v2009_v7 = vmul.f32 %v2005_v61, %v1993_v3 }
 0xc13   :  { %v2008_v4 = vmul.f32 %v2004_v63, %v1992_v62 }
 0xc15   :  { %2472 = vmatprep.mubr.msk.f32.mxu1 %vm2025_vm3, %v2008_v4 }
 0xc16   :  { %2473 = vmatmul.mubr.msk.f32.gmra.mxu1 %vm2025_vm3, %v2009_v7 }
 0xc49   :  { %v2471_v10 = vpop.f32.mrf.mxu1 }
 0xc4a   :  { %v2110_v11 = vadd.f32 %v2471_v10, %v2206_v9 }
 0xc4b   :  { %v2104_v0 = vpop.f32.mrf.mxu1 }
 0xc4c   :  { %v2124_v12 = vadd.f32 %v2110_v11, %v3076_v8  ;;  %v2105_v13 = vadd.f32 %v2206_v9, %v2104_v0 }
 0xc4e   :  { %2128 = vst.msk [vmem:[#allocation16 + $0x8] sm:$0xff] %vm170_vm0, %v2124_v12  ;;  %v2123_v2 = vadd.f32 %v2105_v13, %v3072_v6 }
 0xc50   :  { %2127 = vst.msk [vmem:[#allocation16] sm:$0xff] %vm170_vm0, %v2123_v2 }
 0xcd6   :  { %v2474_v14 = vpop.f32.mrf.mxu1 }
 0xcd7   :  { %v2120_v15 = vadd.f32 %v2474_v14, %v2206_v9 }
 0xcd8   :  { %v2114_v19 = vpop.f32.mrf.mxu1 }
 0xcd9   :  { %v2126_v20 = vadd.f32 %v2120_v15, %v3112_v52  ;;  %v2115_v21 = vadd.f32 %v2206_v9, %v2114_v19 }
 0xcdb   :  { %2130 = vst.msk [vmem:[#allocation16 + $0x18] sm:$0xff] %vm170_vm0, %v2126_v20  ;;  %v2125_v22 = vadd.f32 %v2115_v21, %v3108_v50 }
 0xcdd   :  { %2129 = vst.msk [vmem:[#allocation16 + $0x10] sm:$0xff] %vm170_vm0, %v2125_v22 }
 0xcde   :  { %2714 = shalt.err (!%p2711_p2)
}
 0xcdf   :  { %2142 = dma.vmem_to_hbm [thread:$0]  %s2137_s5, 512, %s3197_s17, [#allocation4], %s2736_s27, %s2736_s27, %s2737_s28  }
 0xce0   :  { %2733 = dma.done.wait [#allocation4], 512  }
 0xce1   :  { %2734 = vsyncadd [#allocation4], 4294966784 }
 0xce2   :  { %2146 = vsyncpa [#allocation3], 1 }
 0xce3   :  { %2147 = vsyncpa [#allocation6], 1 }
 0xce4   :  { %2148 = vsyncpa [#allocation9], 1 }
 0xce5   :  { %2149 = vsyncpa [#allocation12], 1 }
 0xce6   :  { %2150 = vsyncpa [#allocation15], 1 }
 0xce7   :  { %2151 = vsyncpa [#allocation4], 1 }

</bundles_post_ra>
